<compile_context>
chip_gen: v7x
topology: tpu7x:2x2x1
jax: 0.10.0
libtpu: 0.0.40
codegen_flags: <defaults>
</compile_context>

<pallas_src>
import functools

import jax
import jax.numpy as jnp
from jax.experimental import pallas as pl
from jax.experimental.pallas import tpu as pltpu


def _nl_mapping_conv_kernel(x_ref, w1_ref, b1_ref, w2_ref, b2_ref, o_ref,
                            *, sub, n_sub, compute_dtype):
    # x_ref : (1, C, THW)  input tile in its native dtype (cast in-kernel)
    # w1_ref: (C, C)       compute_dtype, (out, in) layout, VMEM-resident
    # b1_ref: (C, 1)       f32
    # w2_ref: (C, C)       compute_dtype, (out, in) layout, VMEM-resident
    # b2_ref: (C, 1)       f32
    # o_ref : (1, C, THW)  output tile
    w1 = w1_ref[...]
    w2 = w2_ref[...]
    b1 = b1_ref[...]
    b2 = b2_ref[...]

    # Static sub-tile loop (trip count <= 8 by default): bounds the f32
    # intermediate to (C, sub) while the DMA block stays large.
    for j in range(n_sub):
        start = j * sub                                        # static, 128-aligned
        xs = x_ref[0, :, pl.ds(start, sub)].astype(compute_dtype)
        h = jnp.dot(w1, xs, preferred_element_type=jnp.float32)     # (C, sub) f32
        h = jnp.maximum(h + b1, 0.0).astype(compute_dtype)          # bias + ReLU
        y = jnp.dot(w2, h, preferred_element_type=jnp.float32) + b2
        o_ref[0, :, pl.ds(start, sub)] = y.astype(o_ref.dtype)


def _round_down(a, m):
    return (a // m) * m


def _choose_tile_hw(hw, batch, tile_hw):
    """Lane-dense HW tile: multiple of 128, as big as allowed, but keeping
    >= 4 total grid steps so both v7x TensorCores stay pipelined."""
    if hw <= 128:
        return hw                       # block == full array dim is always legal
    want_per_batch = max(1, pl.cdiv(4, batch))
    t = min(tile_hw, hw, pl.cdiv(hw, want_per_batch))
    if t > 512:
        t = _round_down(t, 512)         # keeps the 256-wide inner loop exact
    else:
        t = max(128, _round_down(t, 128))
    return t


def prepare_params(w1, b1, w2, b2, *, compute_dtype=jnp.bfloat16):
    """One-time prep of torch-layout 1x1-conv params.

    w1, w2: (C_out, C_in, 1, 1);  b1, b2: (C_out,).
    For the NCHW formulation (W @ x) the (out, in) torch layout is already the
    LHS layout we need -- just squeeze + cast.  Biases become (C, 1) f32.
    """
    c_out, c_in = w1.shape[0], w1.shape[1]
    w1_2d = w1.reshape(c_out, c_in).astype(compute_dtype)
    w2_2d = w2.reshape(c_out, c_in).astype(compute_dtype)
    b1_c = b1.reshape(c_out, 1).astype(jnp.float32)
    b2_c = b2.reshape(c_out, 1).astype(jnp.float32)
    return w1_2d, b1_c, w2_2d, b2_c


@functools.partial(jax.jit,
                   static_argnames=("tile_hw", "compute_dtype", "out_dtype"))
def nl_mapping_conv(x, w1_2d, b1_c, w2_2d, b2_c, *, tile_hw=2048,
                    compute_dtype=jnp.bfloat16, out_dtype=None):
    """x: (B, C, H, W) NCHW; params from prepare_params()."""
    B, C, H, W = x.shape
    HW = H * W
    out_dtype = x.dtype if out_dtype is None else out_dtype

    x3d = x.reshape(B, C, HW)            # free: no data movement in NCHW layout

    thw = _choose_tile_hw(HW, B, tile_hw)
    if thw > 256 and thw % 256 == 0:
        sub, n_sub = 256, thw // 256     # inner sub-tile loop
    else:
        sub, n_sub = thw, 1              # small tile: single pass

    grid = (B, pl.cdiv(HW, thw))         # ragged last block handled by masking

    x_bytes = jnp.dtype(x.dtype).itemsize
    o_bytes = jnp.dtype(out_dtype).itemsize
    w_bytes = jnp.dtype(compute_dtype).itemsize
    cost = pl.CostEstimate(
        flops=4 * B * HW * C * C,                       # two C x C matmuls per pixel
        transcendentals=0,
        bytes_accessed=(B * HW * C * (x_bytes + o_bytes)
                        + 2 * C * C * w_bytes           # resident weights
                        + 2 * C * 4),                   # biases (f32)
    )

    kernel = functools.partial(_nl_mapping_conv_kernel,
                               sub=sub, n_sub=n_sub, compute_dtype=compute_dtype)

    y3d = pl.pallas_call(
        kernel,
        out_shape=jax.ShapeDtypeStruct((B, C, HW), out_dtype),
        grid_spec=pltpu.PrefetchScalarGridSpec(
            num_scalar_prefetch=0,
            grid=grid,
            in_specs=[
                pl.BlockSpec((1, C, thw), lambda b, j: (b, 0, j)),  # x block
                pl.BlockSpec((C, C), lambda b, j: (0, 0)),          # W1 (resident)
                pl.BlockSpec((C, 1), lambda b, j: (0, 0)),          # b1
                pl.BlockSpec((C, C), lambda b, j: (0, 0)),          # W2 (resident)
                pl.BlockSpec((C, 1), lambda b, j: (0, 0)),          # b2
            ],
            out_specs=pl.BlockSpec((1, C, thw), lambda b, j: (b, 0, j)),
        ),
        compiler_params=pltpu.CompilerParams(
            dimension_semantics=("parallel", "parallel"),
        ),
        cost_estimate=cost,
    )(x3d, w1_2d, b1_c, w2_2d, b2_c)

    return y3d.reshape(B, C, H, W)


def _reference(x, w1, b1, w2, b2):
    # Pure-JAX reference of the two 1x1 convs (f32).
    c_out, c_in = w1.shape[0], w1.shape[1]
    w1_2d = w1.reshape(c_out, c_in)
    w2_2d = w2.reshape(c_out, c_in)
    h = jnp.einsum("oi,bihw->bohw", w1_2d, x) + b1[None, :, None, None]
    h = jnp.maximum(h, 0.0)
    return jnp.einsum("oi,bihw->bohw", w2_2d, h) + b2[None, :, None, None]


if __name__ == "__main__":
    key = jax.random.PRNGKey(0)
    B, C, H, W = 2, 128, 32, 32      # latent_dim = 128, HW = 1024 (exercises sub-tiling)

    k_x, k_w1, k_b1, k_w2, k_b2 = jax.random.split(key, 5)
    bound = 1.0 / jnp.sqrt(jnp.float32(C))   # ~torch Conv2d default init scale
    x = jax.random.normal(k_x, (B, C, H, W), dtype=jnp.float32)
    w1 = jax.random.uniform(k_w1, (C, C, 1, 1), jnp.float32, -bound, bound)
    b1 = jax.random.uniform(k_b1, (C,), jnp.float32, -bound, bound)
    w2 = jax.random.uniform(k_w2, (C, C, 1, 1), jnp.float32, -bound, bound)
    b2 = jax.random.uniform(k_b2, (C,), jnp.float32, -bound, bound)

    params = prepare_params(w1, b1, w2, b2)          # one-time prep (hoisted)
    out = jax.block_until_ready(nl_mapping_conv(x, *params))

    ref = _reference(x, w1, b1, w2, b2)
    assert out.shape == (B, C, H, W)
    # bf16 compute / f32 accumulation -> loosened tolerance vs. pure-f32 ref.
    assert jnp.allclose(out, ref, atol=5e-2, rtol=5e-2), "mismatch vs reference"

    print("KERNEL_OK")
</pallas_src>

<mosaic_0001>
module attributes {stable_mosaic.version = 11 : i64} {
  func.func @_nl_mapping_conv_kernel(%arg0: i32, %arg1: i32, %arg2: memref<1x128x512xf32, #tpu.memory_space<vmem>>, %arg3: memref<128x128xbf16, #tpu.memory_space<vmem>>, %arg4: memref<128x1xf32, #tpu.memory_space<vmem>>, %arg5: memref<128x128xbf16, #tpu.memory_space<vmem>>, %arg6: memref<128x1xf32, #tpu.memory_space<vmem>>, %arg7: memref<1x128x512xf32, #tpu.memory_space<vmem>>) attributes {dimension_semantics = [#tpu.dimension_semantics<parallel>, #tpu.dimension_semantics<parallel>], iteration_bounds = array<i64: 2, 2>, scalar_prefetch = 0 : i64, scratch_operands = 0 : i64, tpu.core_type = #tpu.core_type<tc>, window_params = [{transform_indices = @transform_0, window_bounds = array<i64: 1, 128, 512>}, {pipeline_mode = #tpu.pipeline_mode<synchronous>, transform_indices = @transform_1, window_bounds = array<i64: 128, 128>}, {pipeline_mode = #tpu.pipeline_mode<synchronous>, transform_indices = @transform_2, window_bounds = array<i64: 128, 1>}, {pipeline_mode = #tpu.pipeline_mode<synchronous>, transform_indices = @transform_3, window_bounds = array<i64: 128, 128>}, {pipeline_mode = #tpu.pipeline_mode<synchronous>, transform_indices = @transform_4, window_bounds = array<i64: 128, 1>}, {transform_indices = @transform_5, window_bounds = array<i64: 1, 128, 512>}]} {
    %c0 = arith.constant 0 : index
    %c0_0 = arith.constant 0 : index
    %0 = vector.load %arg3[%c0, %c0_0] : memref<128x128xbf16, #tpu.memory_space<vmem>>, vector<128x128xbf16>
    %c0_1 = arith.constant 0 : index
    %c0_2 = arith.constant 0 : index
    %1 = vector.load %arg5[%c0_1, %c0_2] : memref<128x128xbf16, #tpu.memory_space<vmem>>, vector<128x128xbf16>
    %c0_3 = arith.constant 0 : index
    %c0_4 = arith.constant 0 : index
    %2 = vector.load %arg4[%c0_3, %c0_4] : memref<128x1xf32, #tpu.memory_space<vmem>>, vector<128x1xf32>
    %c0_5 = arith.constant 0 : index
    %c0_6 = arith.constant 0 : index
    %3 = vector.load %arg6[%c0_5, %c0_6] : memref<128x1xf32, #tpu.memory_space<vmem>>, vector<128x1xf32>
    %c0_7 = arith.constant 0 : index
    %c0_8 = arith.constant 0 : index
    %c0_9 = arith.constant 0 : index
    %4 = vector.load %arg2[%c0_7, %c0_8, %c0_9] : memref<1x128x512xf32, #tpu.memory_space<vmem>>, vector<1x128x256xf32>
    %5 = vector.shape_cast %4 : vector<1x128x256xf32> to vector<128x256xf32>
    %6 = arith.truncf %5 : vector<128x256xf32> to vector<128x256xbf16>
    %cst = arith.constant dense<0.000000e+00> : vector<128x256xf32>
    %7 = tpu.matmul %0, %6, %cst {dimension_numbers = #tpu.dot_dimension_numbers<[1], [0], [0], [1], [0, 0, 1, 1], [], []>} : vector<128x128xbf16>, vector<128x256xbf16>, vector<128x256xf32> -> vector<128x256xf32>
    %8 = vector.broadcast %2 : vector<128x1xf32> to vector<128x256xf32>
    %9 = arith.addf %7, %8 : vector<128x256xf32>
    %cst_10 = arith.constant 0.000000e+00 : f32
    %10 = vector.broadcast %cst_10 : f32 to vector<128x256xf32>
    %11 = arith.maximumf %9, %10 : vector<128x256xf32>
    %12 = arith.truncf %11 : vector<128x256xf32> to vector<128x256xbf16>
    %cst_11 = arith.constant dense<0.000000e+00> : vector<128x256xf32>
    %13 = tpu.matmul %1, %12, %cst_11 {dimension_numbers = #tpu.dot_dimension_numbers<[1], [0], [0], [1], [0, 0, 1, 1], [], []>} : vector<128x128xbf16>, vector<128x256xbf16>, vector<128x256xf32> -> vector<128x256xf32>
    %14 = vector.broadcast %3 : vector<128x1xf32> to vector<128x256xf32>
    %15 = arith.addf %13, %14 : vector<128x256xf32>
    %c0_12 = arith.constant 0 : index
    %c0_13 = arith.constant 0 : index
    %c0_14 = arith.constant 0 : index
    %16 = vector.load %arg7[%c0_12, %c0_13, %c0_14] : memref<1x128x512xf32, #tpu.memory_space<vmem>>, vector<1x128x256xf32>
    %17 = vector.shape_cast %16 : vector<1x128x256xf32> to vector<128x256xf32>
    %18 = vector.shape_cast %15 : vector<128x256xf32> to vector<1x128x256xf32>
    tpu.vector_store %arg7[%c0_12, %c0_13, %c0_14], %18 {strides = array<i32>} : memref<1x128x512xf32, #tpu.memory_space<vmem>>, vector<1x128x256xf32>,
    %c0_15 = arith.constant 0 : index
    %c0_16 = arith.constant 0 : index
    %c256 = arith.constant 256 : index
    %19 = vector.load %arg2[%c0_15, %c0_16, %c256] : memref<1x128x512xf32, #tpu.memory_space<vmem>>, vector<1x128x256xf32>
    %20 = vector.shape_cast %19 : vector<1x128x256xf32> to vector<128x256xf32>
    %21 = arith.truncf %20 : vector<128x256xf32> to vector<128x256xbf16>
    %cst_17 = arith.constant dense<0.000000e+00> : vector<128x256xf32>
    %22 = tpu.matmul %0, %21, %cst_17 {dimension_numbers = #tpu.dot_dimension_numbers<[1], [0], [0], [1], [0, 0, 1, 1], [], []>} : vector<128x128xbf16>, vector<128x256xbf16>, vector<128x256xf32> -> vector<128x256xf32>
    %23 = vector.broadcast %2 : vector<128x1xf32> to vector<128x256xf32>
    %24 = arith.addf %22, %23 : vector<128x256xf32>
    %cst_18 = arith.constant 0.000000e+00 : f32
    %25 = vector.broadcast %cst_18 : f32 to vector<128x256xf32>
    %26 = arith.maximumf %24, %25 : vector<128x256xf32>
    %27 = arith.truncf %26 : vector<128x256xf32> to vector<128x256xbf16>
    %cst_19 = arith.constant dense<0.000000e+00> : vector<128x256xf32>
    %28 = tpu.matmul %1, %27, %cst_19 {dimension_numbers = #tpu.dot_dimension_numbers<[1], [0], [0], [1], [0, 0, 1, 1], [], []>} : vector<128x128xbf16>, vector<128x256xbf16>, vector<128x256xf32> -> vector<128x256xf32>
    %29 = vector.broadcast %3 : vector<128x1xf32> to vector<128x256xf32>
    %30 = arith.addf %28, %29 : vector<128x256xf32>
    %c0_20 = arith.constant 0 : index
    %c0_21 = arith.constant 0 : index
    %c256_22 = arith.constant 256 : index
    %31 = vector.load %arg7[%c0_20, %c0_21, %c256_22] : memref<1x128x512xf32, #tpu.memory_space<vmem>>, vector<1x128x256xf32>
    %32 = vector.shape_cast %31 : vector<1x128x256xf32> to vector<128x256xf32>
    %33 = vector.shape_cast %30 : vector<128x256xf32> to vector<1x128x256xf32>
    tpu.vector_store %arg7[%c0_20, %c0_21, %c256_22], %33 {strides = array<i32>} : memref<1x128x512xf32, #tpu.memory_space<vmem>>, vector<1x128x256xf32>,
    return
  }
  func.func @transform_0(%arg0: i32, %arg1: i32) -> (i32, i32, i32) {
    %c0_i32 = arith.constant 0 : i32
    %c0_i32_0 = arith.constant 0 : i32
    return %arg0, %c0_i32, %arg1 : i32, i32, i32
  }
  func.func @transform_1(%arg0: i32, %arg1: i32) -> (i32, i32) {
    %c0_i32 = arith.constant 0 : i32
    %c0_i32_0 = arith.constant 0 : i32
    %c0_i32_1 = arith.constant 0 : i32
    return %c0_i32, %c0_i32_0 : i32, i32
  }
  func.func @transform_2(%arg0: i32, %arg1: i32) -> (i32, i32) {
    %c0_i32 = arith.constant 0 : i32
    %c0_i32_0 = arith.constant 0 : i32
    %c0_i32_1 = arith.constant 0 : i32
    return %c0_i32, %c0_i32_0 : i32, i32
  }
  func.func @transform_3(%arg0: i32, %arg1: i32) -> (i32, i32) {
    %c0_i32 = arith.constant 0 : i32
    %c0_i32_0 = arith.constant 0 : i32
    %c0_i32_1 = arith.constant 0 : i32
    return %c0_i32, %c0_i32_0 : i32, i32
  }
  func.func @transform_4(%arg0: i32, %arg1: i32) -> (i32, i32) {
    %c0_i32 = arith.constant 0 : i32
    %c0_i32_0 = arith.constant 0 : i32
    %c0_i32_1 = arith.constant 0 : i32
    return %c0_i32, %c0_i32_0 : i32, i32
  }
  func.func @transform_5(%arg0: i32, %arg1: i32) -> (i32, i32, i32) {
    %c0_i32 = arith.constant 0 : i32
    %c0_i32_0 = arith.constant 0 : i32
    return %arg0, %c0_i32, %arg1 : i32, i32, i32
  }
}

</mosaic_0001>

<bundles_post_ra>
// kernel: nl_mapping_conv.1
= control target key start
LH: loop header
LB: loop body
LE: loop exit
PB: predicated region body
PF: predicated region fallthrough
CT: control target
= control target key end

     0   :  { %s1838_s18 = smov 0   ;;  %s1840_s19 = smov 0   ;;  %s2734_s0 = inlined_call_operand.vmem [shape: f32[2,128,1024], index: 0, kind: input, shape index: {}]   ;;  %s2735_s1 = inlined_call_operand.vmem [shape: bf16[128,128], index: 1, kind: input, shape index: {}]   ;;  %s2736_s2 = inlined_call_operand.vmem [shape: f32[128,1], index: 2, kind: input, shape index: {}]   ;;  %s2737_s3 = inlined_call_operand.vmem [shape: bf16[128,128], index: 3, kind: input, shape index: {}]   ;;  %s2738_s4 = inlined_call_operand.vmem [shape: f32[128,1], index: 4, kind: input, shape index: {}]   ;;  %s2739_s5 = inlined_call_operand.vmem [shape: f32[2,128,1024], index: 5, kind: output, shape index: {}]  }
   0x1   :  { %s1842_s20 = smov 0   ;;  %s1844_s21 = smov 0  }
   0x2   :  { %s1846_s22 = smov 0   ;;  %s1848_s23 = smov 0  }
   0x3   :  { %s1850_s24 = smov 0  }
   0x4 LB: > { %s24_s25 = sadd.s32 1, %s1797_s22  ;;  %s27_s26 = sadd.s32 1, %s1801_s23  ;;  %s1805_s24 = sphi %s1850_s24, %s15_s24   ;;  %s1801_s23 = sphi %s1848_s23, %s2746_s23   ;;  %s1797_s22 = sphi %s1846_s22, %s2745_s22   ;;  %s1793_s21 = sphi %s1844_s21, %s2744_s21   ;;  %s1789_s20 = sphi %s1842_s20, %s2743_s20   ;;  %s1785_s19 = sphi %s1840_s19, %s2742_s19   ;;  %s1781_s18 = sphi %s1838_s18, %s2741_s18  }
   0x5   : > { %p25_p0 = scmp.ge.s32.totalorder %s24_s25, 2  ;;  %s1643_s27 = sadd.s32 4294967295, %s1805_s24  }
   0x6   : > { %p43_p1 = scmp.ne.s32.totalorder %s1785_s19, %s1781_s18  ;;  %p44_p2 = scmp.eq.s32.totalorder %s1805_s24, 0 }
   0x7   : > { %s2748_s25 = smov (%p25_p0, %s24_s25), 0  ;;  %s2750_s26 = smov (!%p25_p0, %s27_s26), %s1801_s23 }
   0x8   : > { %p29_p3 = scmp.ge.s32.totalorder %s2750_s26, 2  ;;  %p159_p4 = scmp.eq.s32.totalorder %s1643_s27, 3 }
   0x9   : > { %s32_s28 = ssub.s32 %s1797_s22, %s2748_s25  ;;  %p45_p5 = por %p44_p2, %p43_p1 }
   0xa   : > { %s2752_s26 = smov (%p29_p3, %s2750_s26), 0  ;;  %p1886_p6 = por %p159_p4, %p43_p1 }
   0xb   : > { %s31_s30 = ssub.s32 %s1801_s23, %s2752_s26  ;;  %s36_s7 = sadd.s32 1, %s1785_s19 }
   0xc   : > { %s33_s6 = sor.u32 %s32_s28, %s31_s30  ;;  %p1646_p8 = scmp.ge.s32.totalorder %s1805_s24, 4 }
   0xd   : > { %p34_p7 = scmp.eq.s32.totalorder %s33_s6, 0 }
   0xe   : > { %193 = sbr.rel (%p1646_p8) target bundleno = 60 (0x3c), region = 32 }
   0xf   : > { %s1894_s8 = scalar_select %p34_p7, %s1785_s19, %s36_s7  }
  0x15   : > { %196 = sbr.rel (!%p45_p5) target bundleno = 60 (0x3c), region = 36  ;;  %s198_s9 = sand.u32 (%p45_p5), 1, %s1785_s19  }
  0x16   : > { %s1648_s10 = sshll.u32 (%p45_p5), %s1797_s22, 2  ;;  %s1647_s11 = sshll.u32 (%p45_p5), %s198_s9, 9 }
  0x17   : > { %s1649_s12 = sshll.u32 (%p45_p5), %s1801_s23, 7  ;;  %s1908_s27 = scalar_lea.vmem (%p45_p5), [#allocation2], %s1647_s11 }
  0x18   : > { %s203_s13 = sadd.s32 (%p45_p5), %s1649_s12, %s1648_s10 }
  0x19   : > { %s1650_s14 = sshll.u32 (%p45_p5), %s203_s13, 3 }
  0x1a   : > { %s1903_s17 = scalar_lea.vmem (%p45_p5), %s2734_s0, %s1650_s14 }
  0x1b   : > { %v218_v0 = vld [vmem:[%s1903_s17] sm:$0xff] (%p45_p5)  ;;  %v220_v1 = vld [vmem:[%s1903_s17 + $0x8] sm:$0xff] (%p45_p5)  ;;  %v222_v2 = vld [vmem:[%s1903_s17 + $0x10] sm:$0xff] (%p45_p5) }
  0x1c   : > { %219 = vst [vmem:[%s1908_s27] sm:$0xff] %v218_v0  ;;  %221 = vst [vmem:[%s1908_s27 + $0x8] sm:$0xff] %v220_v1  ;;  %v224_v3 = vld [vmem:[%s1903_s17 + $0x18] sm:$0xff]  ;;  %v226_v4 = vld [vmem:[%s1903_s17 + $0x40] sm:$0xff] }
  0x1d   : > { %223 = vst [vmem:[%s1908_s27 + $0x10] sm:$0xff] %v222_v2  ;;  %v228_v5 = vld [vmem:[%s1903_s17 + $0x48] sm:$0xff]  ;;  %225 = vst [vmem:[%s1908_s27 + $0x18] sm:$0xff] %v224_v3  ;;  %v230_v6 = vld [vmem:[%s1903_s17 + $0x50] sm:$0xff] }
  0x1e   : > { %227 = vst [vmem:[%s1908_s27 + $0x20] sm:$0xff] %v226_v4  ;;  %229 = vst [vmem:[%s1908_s27 + $0x28] sm:$0xff] %v228_v5  ;;  %v232_v7 = vld [vmem:[%s1903_s17 + $0x58] sm:$0xff]  ;;  %v234_v8 = vld [vmem:[%s1903_s17 + $0x80] sm:$0xff] }
  0x1f   : > { %231 = vst [vmem:[%s1908_s27 + $0x30] sm:$0xff] %v230_v6  ;;  %233 = vst [vmem:[%s1908_s27 + $0x38] sm:$0xff] %v232_v7  ;;  %v236_v9 = vld [vmem:[%s1903_s17 + $0x88] sm:$0xff]  ;;  %v238_v10 = vld [vmem:[%s1903_s17 + $0x90] sm:$0xff] }
  0x20   : > { %235 = vst [vmem:[%s1908_s27 + $0x40] sm:$0xff] %v234_v8  ;;  %v240_v11 = vld [vmem:[%s1903_s17 + $0x98] sm:$0xff]  ;;  %237 = vst [vmem:[%s1908_s27 + $0x48] sm:$0xff] %v236_v9  ;;  %v242_v12 = vld [vmem:[%s1903_s17 + $0xc0] sm:$0xff] }
  0x21   : > { %239 = vst [vmem:[%s1908_s27 + $0x50] sm:$0xff] %v238_v10  ;;  %241 = vst [vmem:[%s1908_s27 + $0x58] sm:$0xff] %v240_v11  ;;  %v244_v13 = vld [vmem:[%s1903_s17 + $0xc8] sm:$0xff]  ;;  %v246_v14 = vld [vmem:[%s1903_s17 + $0xd0] sm:$0xff] }
  0x22   : > { %243 = vst [vmem:[%s1908_s27 + $0x60] sm:$0xff] %v242_v12  ;;  %245 = vst [vmem:[%s1908_s27 + $0x68] sm:$0xff] %v244_v13  ;;  %v248_v15 = vld [vmem:[%s1903_s17 + $0xd8] sm:$0xff]  ;;  %v250_v16 = vld [vmem:[%s1903_s17 + $0x100] sm:$0xff] }
  0x23   : > { %247 = vst [vmem:[%s1908_s27 + $0x70] sm:$0xff] %v246_v14  ;;  %v252_v17 = vld [vmem:[%s1903_s17 + $0x108] sm:$0xff]  ;;  %249 = vst [vmem:[%s1908_s27 + $0x78] sm:$0xff] %v248_v15  ;;  %v254_v18 = vld [vmem:[%s1903_s17 + $0x110] sm:$0xff] }
  0x24   : > { %251 = vst [vmem:[%s1908_s27 + $0x80] sm:$0xff] %v250_v16  ;;  %253 = vst [vmem:[%s1908_s27 + $0x88] sm:$0xff] %v252_v17  ;;  %v256_v19 = vld [vmem:[%s1903_s17 + $0x118] sm:$0xff]  ;;  %v258_v20 = vld [vmem:[%s1903_s17 + $0x140] sm:$0xff] }
  0x25   : > { %255 = vst [vmem:[%s1908_s27 + $0x90] sm:$0xff] %v254_v18  ;;  %257 = vst [vmem:[%s1908_s27 + $0x98] sm:$0xff] %v256_v19  ;;  %v260_v21 = vld [vmem:[%s1903_s17 + $0x148] sm:$0xff]  ;;  %v262_v22 = vld [vmem:[%s1903_s17 + $0x150] sm:$0xff] }
  0x26   : > { %259 = vst [vmem:[%s1908_s27 + $0xa0] sm:$0xff] %v258_v20  ;;  %v264_v23 = vld [vmem:[%s1903_s17 + $0x158] sm:$0xff]  ;;  %261 = vst [vmem:[%s1908_s27 + $0xa8] sm:$0xff] %v260_v21  ;;  %v266_v24 = vld [vmem:[%s1903_s17 + $0x180] sm:$0xff] }
  0x27   : > { %263 = vst [vmem:[%s1908_s27 + $0xb0] sm:$0xff] %v262_v22  ;;  %265 = vst [vmem:[%s1908_s27 + $0xb8] sm:$0xff] %v264_v23  ;;  %v268_v25 = vld [vmem:[%s1903_s17 + $0x188] sm:$0xff]  ;;  %v270_v26 = vld [vmem:[%s1903_s17 + $0x190] sm:$0xff] }
  0x28   : > { %267 = vst [vmem:[%s1908_s27 + $0xc0] sm:$0xff] %v266_v24  ;;  %269 = vst [vmem:[%s1908_s27 + $0xc8] sm:$0xff] %v268_v25  ;;  %v272_v27 = vld [vmem:[%s1903_s17 + $0x198] sm:$0xff]  ;;  %v274_v28 = vld [vmem:[%s1903_s17 + $0x1c0] sm:$0xff] }
  0x29   : > { %271 = vst [vmem:[%s1908_s27 + $0xd0] sm:$0xff] %v270_v26  ;;  %v276_v29 = vld [vmem:[%s1903_s17 + $0x1c8] sm:$0xff]  ;;  %273 = vst [vmem:[%s1908_s27 + $0xd8] sm:$0xff] %v272_v27  ;;  %v278_v30 = vld [vmem:[%s1903_s17 + $0x1d0] sm:$0xff] }
  0x2a   : > { %275 = vst [vmem:[%s1908_s27 + $0xe0] sm:$0xff] %v274_v28  ;;  %277 = vst [vmem:[%s1908_s27 + $0xe8] sm:$0xff] %v276_v29  ;;  %v280_v31 = vld [vmem:[%s1903_s17 + $0x1d8] sm:$0xff]  ;;  %v282_v32 = vld [vmem:[%s1903_s17 + $0x200] sm:$0xff] }
  0x2b   : > { %279 = vst [vmem:[%s1908_s27 + $0xf0] sm:$0xff] %v278_v30  ;;  %281 = vst [vmem:[%s1908_s27 + $0xf8] sm:$0xff] %v280_v31  ;;  %v284_v33 = vld [vmem:[%s1903_s17 + $0x208] sm:$0xff]  ;;  %v286_v34 = vld [vmem:[%s1903_s17 + $0x210] sm:$0xff] }
  0x2c   : > { %283 = vst [vmem:[%s1908_s27 + $0x100] sm:$0xff] %v282_v32  ;;  %v288_v35 = vld [vmem:[%s1903_s17 + $0x218] sm:$0xff]  ;;  %285 = vst [vmem:[%s1908_s27 + $0x108] sm:$0xff] %v284_v33  ;;  %v290_v36 = vld [vmem:[%s1903_s17 + $0x240] sm:$0xff] }
  0x2d   : > { %287 = vst [vmem:[%s1908_s27 + $0x110] sm:$0xff] %v286_v34  ;;  %289 = vst [vmem:[%s1908_s27 + $0x118] sm:$0xff] %v288_v35  ;;  %v292_v37 = vld [vmem:[%s1903_s17 + $0x248] sm:$0xff]  ;;  %v294_v38 = vld [vmem:[%s1903_s17 + $0x250] sm:$0xff] }
  0x2e   : > { %291 = vst [vmem:[%s1908_s27 + $0x120] sm:$0xff] %v290_v36  ;;  %293 = vst [vmem:[%s1908_s27 + $0x128] sm:$0xff] %v292_v37  ;;  %v296_v39 = vld [vmem:[%s1903_s17 + $0x258] sm:$0xff]  ;;  %v298_v40 = vld [vmem:[%s1903_s17 + $0x280] sm:$0xff] }
  0x2f   : > { %295 = vst [vmem:[%s1908_s27 + $0x130] sm:$0xff] %v294_v38  ;;  %v300_v41 = vld [vmem:[%s1903_s17 + $0x288] sm:$0xff]  ;;  %297 = vst [vmem:[%s1908_s27 + $0x138] sm:$0xff] %v296_v39  ;;  %v302_v42 = vld [vmem:[%s1903_s17 + $0x290] sm:$0xff] }
  0x30   : > { %299 = vst [vmem:[%s1908_s27 + $0x140] sm:$0xff] %v298_v40  ;;  %301 = vst [vmem:[%s1908_s27 + $0x148] sm:$0xff] %v300_v41  ;;  %v304_v43 = vld [vmem:[%s1903_s17 + $0x298] sm:$0xff]  ;;  %v306_v44 = vld [vmem:[%s1903_s17 + $0x2c0] sm:$0xff] }
  0x31   : > { %303 = vst [vmem:[%s1908_s27 + $0x150] sm:$0xff] %v302_v42  ;;  %305 = vst [vmem:[%s1908_s27 + $0x158] sm:$0xff] %v304_v43  ;;  %v308_v45 = vld [vmem:[%s1903_s17 + $0x2c8] sm:$0xff]  ;;  %v310_v46 = vld [vmem:[%s1903_s17 + $0x2d0] sm:$0xff] }
  0x32   : > { %307 = vst [vmem:[%s1908_s27 + $0x160] sm:$0xff] %v306_v44  ;;  %v312_v47 = vld [vmem:[%s1903_s17 + $0x2d8] sm:$0xff]  ;;  %309 = vst [vmem:[%s1908_s27 + $0x168] sm:$0xff] %v308_v45  ;;  %v314_v48 = vld [vmem:[%s1903_s17 + $0x300] sm:$0xff] }
  0x33   : > { %311 = vst [vmem:[%s1908_s27 + $0x170] sm:$0xff] %v310_v46  ;;  %313 = vst [vmem:[%s1908_s27 + $0x178] sm:$0xff] %v312_v47  ;;  %v316_v49 = vld [vmem:[%s1903_s17 + $0x308] sm:$0xff]  ;;  %v318_v50 = vld [vmem:[%s1903_s17 + $0x310] sm:$0xff] }
  0x34   : > { %315 = vst [vmem:[%s1908_s27 + $0x180] sm:$0xff] %v314_v48  ;;  %317 = vst [vmem:[%s1908_s27 + $0x188] sm:$0xff] %v316_v49  ;;  %v320_v51 = vld [vmem:[%s1903_s17 + $0x318] sm:$0xff]  ;;  %v322_v52 = vld [vmem:[%s1903_s17 + $0x340] sm:$0xff] }
  0x35   : > { %319 = vst [vmem:[%s1908_s27 + $0x190] sm:$0xff] %v318_v50  ;;  %v324_v53 = vld [vmem:[%s1903_s17 + $0x348] sm:$0xff]  ;;  %321 = vst [vmem:[%s1908_s27 + $0x198] sm:$0xff] %v320_v51  ;;  %v326_v54 = vld [vmem:[%s1903_s17 + $0x350] sm:$0xff] }
  0x36   : > { %323 = vst [vmem:[%s1908_s27 + $0x1a0] sm:$0xff] %v322_v52  ;;  %325 = vst [vmem:[%s1908_s27 + $0x1a8] sm:$0xff] %v324_v53  ;;  %v328_v55 = vld [vmem:[%s1903_s17 + $0x358] sm:$0xff]  ;;  %v330_v56 = vld [vmem:[%s1903_s17 + $0x380] sm:$0xff] }
  0x37   : > { %327 = vst [vmem:[%s1908_s27 + $0x1b0] sm:$0xff] %v326_v54  ;;  %329 = vst [vmem:[%s1908_s27 + $0x1b8] sm:$0xff] %v328_v55  ;;  %v332_v57 = vld [vmem:[%s1903_s17 + $0x388] sm:$0xff]  ;;  %v334_v58 = vld [vmem:[%s1903_s17 + $0x390] sm:$0xff] }
  0x38   : > { %331 = vst [vmem:[%s1908_s27 + $0x1c0] sm:$0xff] %v330_v56  ;;  %v336_v59 = vld [vmem:[%s1903_s17 + $0x398] sm:$0xff]  ;;  %333 = vst [vmem:[%s1908_s27 + $0x1c8] sm:$0xff] %v332_v57  ;;  %v338_v60 = vld [vmem:[%s1903_s17 + $0x3c0] sm:$0xff] }
  0x39   : > { %335 = vst [vmem:[%s1908_s27 + $0x1d0] sm:$0xff] %v334_v58  ;;  %337 = vst [vmem:[%s1908_s27 + $0x1d8] sm:$0xff] %v336_v59  ;;  %v340_v61 = vld [vmem:[%s1903_s17 + $0x3c8] sm:$0xff]  ;;  %v342_v62 = vld [vmem:[%s1903_s17 + $0x3d0] sm:$0xff] }
  0x3a   : > { %339 = vst [vmem:[%s1908_s27 + $0x1e0] sm:$0xff] %v338_v60  ;;  %341 = vst [vmem:[%s1908_s27 + $0x1e8] sm:$0xff] %v340_v61  ;;  %v344_v63 = vld [vmem:[%s1903_s17 + $0x3d8] sm:$0xff] }
  0x3b   : > { %343 = vst [vmem:[%s1908_s27 + $0x1f0] sm:$0xff] %v342_v62  ;;  %345 = vst [vmem:[%s1908_s27 + $0x1f8] sm:$0xff] %v344_v63 }
  0x3c PF: > { %p1651_p9 = scmp.ge.s32.totalorder %s1805_s24, 1  ;;  %p350_p10 = scmp.lt.s32.totalorder %s1805_s24, 5 }
  0x3e   : > { %p351_p11 = pnand %p1651_p9, %p350_p10 }
  0x3f   : > { %s357_s28 = sand.u32 (!%p351_p11), 1, %s1781_s18   ;;  %v1807_v0 = vmov (!%p351_p11), 0   ;;  %v418_v46 = vld [vmem:[%s2736_s2] sm:$0xff] (!%p351_p11)  ;;  %v420_v49 = vld [vmem:[%s2736_s2 + $0x10] sm:$0xff] (!%p351_p11)  ;;  %v419_v52 = vld [vmem:[%s2736_s2 + $0x8] sm:$0xff] (!%p351_p11) }
  0x40   : > { %354 = sbr.rel (%p351_p11) target bundleno = 729 (0x2d9), region = 59  ;;  %s2038_s30 = sshll.u32 (!%p351_p11), %s357_s28, 9  ;;  %658 = vmatprep.mubr.bf16.mxu0 (!%p351_p11), %v1807_v0  ;;  %1733 = vset.pattern.permute.xlu0 (!%p351_p11), %v1807_v0  ;;  %v421_v53 = vld [vmem:[%s2736_s2 + $0x18] sm:$0xff] (!%p351_p11)  ;;  %v422_v60 = vld [vmem:[%s2736_s2 + $0x20] sm:$0xff] (!%p351_p11)  ;;  %v423_v62 = vld [vmem:[%s2736_s2 + $0x28] sm:$0xff] (!%p351_p11) }
  0x41   : > { %1734 = vset.pattern.permute.xlu1 (!%p351_p11), %v1807_v0  ;;  %947 = vmatprep.mubr.bf16.mxu1 (!%p351_p11), %v1807_v0  ;;  %s2045_s6 = scalar_lea.vmem (!%p351_p11), [#allocation2], %s2038_s30  ;;  %v2103_v61 = vld [vmem:[%s2735_s1] sm:$0xff] (!%p351_p11)   ;;  %s2420_s7 = scalar_lea.vmem (!%p351_p11), [#allocation3], %s2038_s30 }
  0x42   : > { %v451_v1 = vld [vmem:[%s2045_s6 + $0x8] sm:$0xff] (!%p351_p11)  ;;  %v450_v3 = vld [vmem:[%s2045_s6] sm:$0xff] (!%p351_p11)  ;;  %500 = vperm.xlu0 (!%p351_p11), %1733, %v418_v46   ;;  %v1061_v50 = vld [vmem:[%s2045_s6 + $0x18] sm:$0xff] (!%p351_p11)  ;;  %510 = vperm.xlu1 (!%p351_p11), %1734, %v420_v49  }
  0x43   : > { %v453_v2 = vld [vmem:[%s2045_s6 + $0x28] sm:$0xff] (!%p351_p11)  ;;  %v452_v5 = vld [vmem:[%s2045_s6 + $0x20] sm:$0xff] (!%p351_p11)  ;;  %v1063_v51 = vld [vmem:[%s2045_s6 + $0x38] sm:$0xff] (!%p351_p11) }
  0x44   : > { %v483_v4 = vpack.c.bf16 (!%p351_p11), %v453_v2, %v451_v1  ;;  %v455_v6 = vld [vmem:[%s2045_s6 + $0x48] sm:$0xff] (!%p351_p11)  ;;  %v482_v8 = vpack.c.bf16 (!%p351_p11), %v452_v5, %v450_v3  ;;  %v454_v10 = vld [vmem:[%s2045_s6 + $0x40] sm:$0xff] (!%p351_p11)  ;;  %v1093_v55 = vpack.c.bf16 (!%p351_p11), %v1063_v51, %v1061_v50  ;;  %v1060_v56 = vld [vmem:[%s2045_s6 + $0x10] sm:$0xff] (!%p351_p11) }
  0x45   : > { %v457_v7 = vld [vmem:[%s2045_s6 + $0x68] sm:$0xff] (!%p351_p11)  ;;  %v456_v11 = vld [vmem:[%s2045_s6 + $0x60] sm:$0xff] (!%p351_p11)  ;;  %v1062_v57 = vld [vmem:[%s2045_s6 + $0x30] sm:$0xff] (!%p351_p11) }
  0x46   : > { %v485_v9 = vpack.c.bf16 (!%p351_p11), %v457_v7, %v455_v6  ;;  %v459_v12 = vld [vmem:[%s2045_s6 + $0x88] sm:$0xff] (!%p351_p11)  ;;  %626 = vmatprep.subr.bf16.mxu0 (!%p351_p11), %v483_v4  ;;  %v484_v14 = vpack.c.bf16 (!%p351_p11), %v456_v11, %v454_v10  ;;  %v458_v16 = vld [vmem:[%s2045_s6 + $0x80] sm:$0xff] (!%p351_p11)  ;;  %505 = vperm.xlu0 (!%p351_p11), %1733, %v419_v52   ;;  %v1065_v58 = vld [vmem:[%s2045_s6 + $0x58] sm:$0xff] (!%p351_p11)  ;;  %v1092_v63 = vpack.c.bf16 (!%p351_p11), %v1062_v57, %v1060_v56 }
  0x47   : > { %v461_v13 = vld [vmem:[%s2045_s6 + $0xa8] sm:$0xff]  ;;  %627 = vmatpush1.bf16.msra.mxu0 %v482_v8  ;;  %v460_v17 = vld [vmem:[%s2045_s6 + $0xa0] sm:$0xff]  ;;  %v1067_v59 = vld [vmem:[%s2045_s6 + $0x78] sm:$0xff]  ;;  %515 = vperm.xlu1 %1734, %v421_v53   ;;  %s1671_s30 = sshll.u32 (%p1886_p6), %s1789_s20, 2  ;;  %s1672_s9 = sshll.u32 (%p1886_p6), %s1793_s21, 7 }
  0x48   : > { %628 = vmatprep.subr.bf16.mxu0 %v485_v9  ;;  %v487_v15 = vpack.c.bf16 %v461_v13, %v459_v12  ;;  %v463_v18 = vld [vmem:[%s2045_s6 + $0xc8] sm:$0xff]  ;;  %v486_v20 = vpack.c.bf16 %v460_v17, %v458_v16  ;;  %v462_v22 = vld [vmem:[%s2045_s6 + $0xc0] sm:$0xff]  ;;  %v1095_v1 = vpack.c.bf16 %v1067_v59, %v1065_v58  ;;  %v1064_v2 = vld [vmem:[%s2045_s6 + $0x50] sm:$0xff]  ;;  %s1423_s29 = sadd.s32 (%p1886_p6), %s1672_s9, %s1671_s30 }
  0x49   : > { %v465_v19 = vld [vmem:[%s2045_s6 + $0xe8] sm:$0xff]  ;;  %v464_v23 = vld [vmem:[%s2045_s6 + $0xe0] sm:$0xff]  ;;  %v1066_v3 = vld [vmem:[%s2045_s6 + $0x70] sm:$0xff]  ;;  %s1673_s10 = sshll.u32 (%p1886_p6), %s1423_s29, 3 }
  0x4a   : > { %v489_v21 = vpack.c.bf16 %v465_v19, %v463_v18  ;;  %v467_v24 = vld [vmem:[%s2045_s6 + $0x108] sm:$0xff]  ;;  %v488_v26 = vpack.c.bf16 %v464_v23, %v462_v22  ;;  %v466_v28 = vld [vmem:[%s2045_s6 + $0x100] sm:$0xff]  ;;  %520 = vperm.xlu0 %1733, %v422_v60   ;;  %v1069_v4 = vld [vmem:[%s2045_s6 + $0x98] sm:$0xff]  ;;  %v1094_v10 = vpack.c.bf16 %v1066_v3, %v1064_v2  ;;  %s2592_s13 = scalar_lea.vmem (%p1886_p6), %s2739_s5, %s1673_s10 }
  0x4b   : > { %629 = vmatpush1.bf16.msra.mxu0 %v484_v14  ;;  %v469_v25 = vld [vmem:[%s2045_s6 + $0x128] sm:$0xff]  ;;  %v468_v29 = vld [vmem:[%s2045_s6 + $0x120] sm:$0xff]  ;;  %v1071_v5 = vld [vmem:[%s2045_s6 + $0xb8] sm:$0xff]  ;;  %525 = vperm.xlu1 %1734, %v423_v62  }
  0x4c   : > { %630 = vmatprep.subr.bf16.mxu0 %v487_v15  ;;  %v491_v27 = vpack.c.bf16 %v469_v25, %v467_v24  ;;  %v471_v30 = vld [vmem:[%s2045_s6 + $0x148] sm:$0xff]  ;;  %v490_v32 = vpack.c.bf16 %v468_v29, %v466_v28  ;;  %v470_v33 = vld [vmem:[%s2045_s6 + $0x140] sm:$0xff]  ;;  %v424_v6 = vld [vmem:[%s2736_s2 + $0x30] sm:$0xff]  ;;  %v1097_v15 = vpack.c.bf16 %v1071_v5, %v1069_v4 }
  0x4d   : > { %v473_v31 = vld [vmem:[%s2045_s6 + $0x168] sm:$0xff]  ;;  %v472_v35 = vld [vmem:[%s2045_s6 + $0x160] sm:$0xff]  ;;  %v1068_v7 = vld [vmem:[%s2045_s6 + $0x90] sm:$0xff] }
  0x4e   : > { %v493_v34 = vpack.c.bf16 %v473_v31, %v471_v30  ;;  %v475_v36 = vld [vmem:[%s2045_s6 + $0x188] sm:$0xff]  ;;  %v492_v38 = vpack.c.bf16 %v472_v35, %v470_v33  ;;  %v474_v40 = vld [vmem:[%s2045_s6 + $0x180] sm:$0xff]  ;;  %v1070_v8 = vld [vmem:[%s2045_s6 + $0xb0] sm:$0xff]  ;;  %530 = vperm.xlu0 %1733, %v424_v6  }
  0x4f   : > { %631 = vmatpush1.bf16.msra.mxu0 %v486_v20  ;;  %v477_v37 = vld [vmem:[%s2045_s6 + $0x1a8] sm:$0xff]  ;;  %v476_v41 = vld [vmem:[%s2045_s6 + $0x1a0] sm:$0xff]  ;;  %v425_v9 = vld [vmem:[%s2736_s2 + $0x38] sm:$0xff]  ;;  %v1096_v19 = vpack.c.bf16 %v1070_v8, %v1068_v7 }
  0x50   : > { %632 = vmatprep.subr.bf16.mxu0 %v489_v21  ;;  %v495_v39 = vpack.c.bf16 %v477_v37, %v475_v36  ;;  %v479_v42 = vld [vmem:[%s2045_s6 + $0x1c8] sm:$0xff]  ;;  %v494_v44 = vpack.c.bf16 %v476_v41, %v474_v40  ;;  %v478_v45 = vld [vmem:[%s2045_s6 + $0x1c0] sm:$0xff]  ;;  %v1073_v11 = vld [vmem:[%s2045_s6 + $0xd8] sm:$0xff]  ;;  %535 = vperm.xlu1 %1734, %v425_v9  }
  0x51   : > { %v481_v43 = vld [vmem:[%s2045_s6 + $0x1e8] sm:$0xff]  ;;  %v480_v48 = vld [vmem:[%s2045_s6 + $0x1e0] sm:$0xff]  ;;  %v1075_v12 = vld [vmem:[%s2045_s6 + $0xf8] sm:$0xff] }
  0x52   : > { %v497_v47 = vpack.c.bf16 %v481_v43, %v479_v42  ;;  %v496_v54 = vpack.c.bf16 %v480_v48, %v478_v45  ;;  %v426_v13 = vld [vmem:[%s2736_s2 + $0x40] sm:$0xff]  ;;  %v2130_v14 = vld [vmem:[%s2735_s1 + $0x8] sm:$0xff]   ;;  %v1072_v17 = vld [vmem:[%s2045_s6 + $0xd0] sm:$0xff]  ;;  %v1099_v22 = vpack.c.bf16 %v1075_v12, %v1073_v11 }
  0x53   : > { %633 = vmatpush1.bf16.msra.mxu0 %v488_v26  ;;  %v427_v16 = vld [vmem:[%s2736_s2 + $0x48] sm:$0xff]  ;;  %v1074_v18 = vld [vmem:[%s2045_s6 + $0xf0] sm:$0xff]  ;;  %v1077_v20 = vld [vmem:[%s2045_s6 + $0x118] sm:$0xff]  ;;  %540 = vperm.xlu0 %1733, %v426_v13  }
  0x54   : > { %634 = vmatprep.subr.bf16.mxu0 %v491_v27  ;;  %v1079_v21 = vld [vmem:[%s2045_s6 + $0x138] sm:$0xff]  ;;  %545 = vperm.xlu1 %1734, %v427_v16   ;;  %v428_v23 = vld [vmem:[%s2736_s2 + $0x50] sm:$0xff]  ;;  %v1098_v25 = vpack.c.bf16 %v1074_v18, %v1072_v17  ;;  %v430_v31 = vld [vmem:[%s2736_s2 + $0x60] sm:$0xff] }
  0x55   : > { %v429_v24 = vld [vmem:[%s2736_s2 + $0x58] sm:$0xff]  ;;  %v1101_v26 = vpack.c.bf16 %v1079_v21, %v1077_v20  ;;  %v1076_v27 = vld [vmem:[%s2045_s6 + $0x110] sm:$0xff]  ;;  %v431_v33 = vld [vmem:[%s2736_s2 + $0x68] sm:$0xff] }
  0x56   : > { %v1078_v28 = vld [vmem:[%s2045_s6 + $0x130] sm:$0xff]  ;;  %v1081_v29 = vld [vmem:[%s2045_s6 + $0x158] sm:$0xff]  ;;  %v434_v48 = vld [vmem:[%s2738_s4] sm:$0xff] }
  0x57   : > { %635 = vmatpush1.bf16.msra.mxu0 %v490_v32  ;;  %550 = vperm.xlu0 %1733, %v428_v23   ;;  %v1083_v30 = vld [vmem:[%s2045_s6 + $0x178] sm:$0xff]  ;;  %v2157_v32 = vld [vmem:[%s2735_s1 + $0x10] sm:$0xff]   ;;  %v435_v50 = vld [vmem:[%s2738_s4 + $0x8] sm:$0xff] }
  0x58   : > { %636 = vmatprep.subr.bf16.mxu0 %v493_v34  ;;  %555 = vperm.xlu1 %1734, %v429_v24   ;;  %v1100_v34 = vpack.c.bf16 %v1078_v28, %v1076_v27  ;;  %v1103_v35 = vpack.c.bf16 %v1083_v30, %v1081_v29  ;;  %v1080_v36 = vld [vmem:[%s2045_s6 + $0x150] sm:$0xff]  ;;  %v433_v41 = vld [vmem:[%s2736_s2 + $0x78] sm:$0xff]  ;;  %v438_v58 = vld [vmem:[%s2738_s4 + $0x20] sm:$0xff] }
  0x59   : > { %v1082_v37 = vld [vmem:[%s2045_s6 + $0x170] sm:$0xff]  ;;  %v1089_v46 = vld [vmem:[%s2045_s6 + $0x1d8] sm:$0xff]  ;;  %v1739_v59 = vld [vmem:[%s2735_s1 + $0x20] sm:$0xff]  }
  0x5a   : > { %v432_v40 = vld [vmem:[%s2736_s2 + $0x70] sm:$0xff]  ;;  %v1102_v42 = vpack.c.bf16 %v1082_v37, %v1080_v36  ;;  %v1738_v49 = vld [vmem:[%s2735_s1 + $0x18] sm:$0xff]   ;;  %v439_v60 = vld [vmem:[%s2738_s4 + $0x28] sm:$0xff] }
  0x5b   : > { %637 = vmatpush1.bf16.msra.mxu0 %v492_v38  ;;  %560 = vperm.xlu0 %1733, %v430_v31   ;;  %v1085_v38 = vld [vmem:[%s2045_s6 + $0x198] sm:$0xff]  ;;  %v1086_v45 = vld [vmem:[%s2045_s6 + $0x1b0] sm:$0xff]  ;;  %v1740_v2 = vld [vmem:[%s2735_s1 + $0x28] sm:$0xff]  }
  0x5c   : > { %638 = vmatprep.subr.bf16.mxu0 %v495_v39  ;;  %v1087_v39 = vld [vmem:[%s2045_s6 + $0x1b8] sm:$0xff]  ;;  %565 = vperm.xlu1 %1734, %v431_v33   ;;  %v1088_v53 = vld [vmem:[%s2045_s6 + $0x1d0] sm:$0xff]  ;;  %v443_v3 = vld [vmem:[%s2738_s4 + $0x48] sm:$0xff] }
  0x5d   : > { %v1105_v43 = vpack.c.bf16 %v1087_v39, %v1085_v38  ;;  %v437_v56 = vld [vmem:[%s2738_s4 + $0x18] sm:$0xff]  ;;  %v440_v62 = vld [vmem:[%s2738_s4 + $0x30] sm:$0xff]  ;;  %v446_v6 = vld [vmem:[%s2738_s4 + $0x60] sm:$0xff] }
  0x5e   : > { %v444_v4 = vld [vmem:[%s2738_s4 + $0x50] sm:$0xff]  ;;  %v445_v5 = vld [vmem:[%s2738_s4 + $0x58] sm:$0xff]  ;;  %v447_v8 = vld [vmem:[%s2738_s4 + $0x68] sm:$0xff] }
  0x5f   : > { %639 = vmatpush1.bf16.msra.mxu0 %v494_v44  ;;  %v1084_v44 = vld [vmem:[%s2045_s6 + $0x190] sm:$0xff]  ;;  %570 = vperm.xlu0 %1733, %v432_v40   ;;  %v1742_v11 = vld [vmem:[%s2735_s1 + $0x38] sm:$0xff]  }
  0x60   : > { %640 = vmatprep.subr.bf16.mxu0 %v497_v47  ;;  %v1091_v47 = vld [vmem:[%s2045_s6 + $0x1f8] sm:$0xff]  ;;  %575 = vperm.xlu1 %1734, %v433_v41   ;;  %v1104_v51 = vpack.c.bf16 %v1086_v45, %v1084_v44  ;;  %v1741_v7 = vld [vmem:[%s2735_s1 + $0x30] sm:$0xff]  }
  0x61   : > { %v1107_v52 = vpack.c.bf16 %v1091_v47, %v1089_v46  ;;  %v448_v9 = vld [vmem:[%s2738_s4 + $0x70] sm:$0xff] }
  0x63   : > { %641 = vmatpush1.bf16.msra.mxu0 %v496_v54  ;;  %v1090_v54 = vld [vmem:[%s2045_s6 + $0x1f0] sm:$0xff]  ;;  %789 = vperm.xlu0 %1733, %v434_v48  }
  0x64   : > { %1108 = vmatprep.subr.bf16.mxu0 %v1093_v55  ;;  %794 = vperm.xlu1 %1734, %v435_v50   ;;  %v436_v55 = vld [vmem:[%s2738_s4 + $0x10] sm:$0xff]  ;;  %v1106_v57 = vpack.c.bf16 %v1090_v54, %v1088_v53 }
  0x66   : > { %659 = vmatmul.mubr.bf16.vlgmr.msra.gmra.mrb[0].mxu0 %v2103_v61 }
  0x67   : > { %1109 = vmatpush1.bf16.msra.mxu0 %v1092_v63  ;;  %668 = vmatprep.mubr.bf16.mxu0 %v1807_v0  ;;  %v441_v63 = vld [vmem:[%s2738_s4 + $0x38] sm:$0xff] }
  0x68   : > { %1110 = vmatprep.subr.bf16.mxu0 %v1095_v1  ;;  %799 = vperm.xlu0 %1733, %v436_v55   ;;  %v442_v1 = vld [vmem:[%s2738_s4 + $0x40] sm:$0xff] }
  0x69   : > { %804 = vperm.xlu1 %1734, %v437_v56  }
  0x6b   : > { %1111 = vmatpush1.bf16.msra.mxu0 %v1094_v10  ;;  %v449_v10 = vld [vmem:[%s2738_s4 + $0x78] sm:$0xff] }
  0x6c   : > { %1112 = vmatprep.subr.bf16.mxu0 %v1097_v15  ;;  %809 = vperm.xlu0 %1733, %v438_v58  }
  0x6d   : > { %814 = vperm.xlu1 %1734, %v439_v60  }
  0x6e   : > { %669 = vmatmul.mubr.bf16.gmra.mrb[4].mxu0 %v2130_v14 }
  0x6f   : > { %678 = vmatprep.mubr.bf16.mxu0 %v1807_v0  ;;  %1113 = vmatpush1.bf16.msra.mxu0 %v1096_v19 }
  0x70   : > { %1114 = vmatprep.subr.bf16.mxu0 %v1099_v22  ;;  %819 = vperm.xlu0 %1733, %v440_v62  }
  0x71   : > { %824 = vperm.xlu1 %1734, %v441_v63  }
  0x73   : > { %1115 = vmatpush1.bf16.msra.mxu0 %v1098_v25 }
  0x74   : > { %1116 = vmatprep.subr.bf16.mxu0 %v1101_v26  ;;  %829 = vperm.xlu0 %1733, %v442_v1  }
  0x75   : > { %834 = vperm.xlu1 %1734, %v443_v3  }
  0x76   : > { %679 = vmatmul.mubr.bf16.gmra.mrb[8].mxu0 %v2157_v32 }
  0x77   : > { %688 = vmatprep.mubr.bf16.mxu0 %v1807_v0  ;;  %1117 = vmatpush1.bf16.msra.mxu0 %v1100_v34 }
  0x78   : > { %1118 = vmatprep.subr.bf16.mxu0 %v1103_v35  ;;  %839 = vperm.xlu0 %1733, %v444_v4  }
  0x79   : > { %844 = vperm.xlu1 %1734, %v445_v5  }
  0x7b   : > { %1119 = vmatpush1.bf16.msra.mxu0 %v1102_v42 }
  0x7c   : > { %1120 = vmatprep.subr.bf16.mxu0 %v1105_v43  ;;  %849 = vperm.xlu0 %1733, %v446_v6  }
  0x7d   : > { %854 = vperm.xlu1 %1734, %v447_v8  }
  0x7e   : > { %689 = vmatmul.mubr.bf16.gmra.mrb[12].mxu0 %v1738_v49 }
  0x7f   : > { %698 = vmatprep.mubr.bf16.mxu0 %v1807_v0  ;;  %1121 = vmatpush1.bf16.msra.mxu0 %v1104_v51 }
  0x80   : > { %1122 = vmatprep.subr.bf16.mxu0 %v1107_v52  ;;  %859 = vperm.xlu0 %1733, %v448_v9  }
  0x81   : > { %864 = vperm.xlu1 %1734, %v449_v10  }
  0x83   : > { %1123 = vmatpush1.bf16.msra.mxu0 %v1106_v57 }
  0x86   : > { %699 = vmatmul.mubr.bf16.gmra.mrb[16].mxu0 %v1739_v59 }
  0x87   : > { %708 = vmatprep.mubr.bf16.mxu0 %v1807_v0 }
  0x8e   : > { %709 = vmatmul.mubr.bf16.gmra.mrb[20].mxu0 %v1740_v2 }
  0x8f   : > { %718 = vmatprep.mubr.bf16.mxu0 %v1807_v0 }
  0x96   : > { %719 = vmatmul.mubr.bf16.gmra.mrb[24].mxu0 %v1741_v7 }
  0x97   : > { %728 = vmatprep.mubr.bf16.mxu0 %v1807_v0 }
  0x9e   : > { %729 = vmatmul.mubr.bf16.gmra.mrb[28].mxu0 %v1742_v11 }
  0x9f   : > { %1140 = vmatprep.mubr.bf16.mxu0 %v1807_v0 }
  0xa6   : > { %1141 = vmatmul.mubr.bf16.vlgmr.msra.gmra.mrb[32].mxu0 %v2103_v61 }
  0xa7   : > { %1150 = vmatprep.mubr.bf16.mxu0 %v1807_v0 }
  0xae   : > { %1151 = vmatmul.mubr.bf16.gmra.mrb[36].mxu0 %v2130_v14 }
  0xaf   : > { %1160 = vmatprep.mubr.bf16.mxu0 %v1807_v0 }
  0xb6   : > { %1161 = vmatmul.mubr.bf16.gmra.mrb[40].mxu0 %v2157_v32 }
  0xb7   : > { %1170 = vmatprep.mubr.bf16.mxu0 %v1807_v0 }
  0xbe   : > { %1171 = vmatmul.mubr.bf16.gmra.mrb[44].mxu0 %v1738_v49 }
  0xbf   : > { %1180 = vmatprep.mubr.bf16.mxu0 %v1807_v0 }
  0xc1   : > { %v2258_v61 = vpop.permute.xlu0 %500  ;;  %v2265_v20 = vpop.permute.xlu1 %510 }
  0xc5   : > { %v2261_v15 = vpop.permute.xlu0 %505 }
  0xc6   : > { %1181 = vmatmul.mubr.bf16.gmra.mrb[48].mxu0 %v1739_v59  ;;  %v2269_v31 = vpop.permute.xlu1 %515 }
  0xc7   : > { %1190 = vmatprep.mubr.bf16.mxu0 %v1807_v0 }
  0xc9   : > { %v2274_v42 = vpop.permute.xlu0 %520 }
  0xca   : > { %v2277_v47 = vpop.permute.xlu1 %525 }
  0xcd   : > { %v2282_v58 = vpop.permute.xlu0 %530 }
  0xce   : > { %1191 = vmatmul.mubr.bf16.gmra.mrb[52].mxu0 %v1740_v2 }
  0xcf   : > { %1200 = vmatprep.mubr.bf16.mxu0 %v1807_v0  ;;  %v2285_v1 = vpop.permute.xlu1 %535 }
  0xd6   : > { %1201 = vmatmul.mubr.bf16.gmra.mrb[56].mxu0 %v1741_v7 }
  0xd7   : > { %1210 = vmatprep.mubr.bf16.mxu0 %v1807_v0 }
  0xde   : > { %1211 = vmatmul.mubr.bf16.gmra.mrb[60].mxu0 %v1742_v11 }
 0x139   : > { %v660_v12 = vpop.f32.mrb[0].mxu0 }
 0x13a   : > { %v661_v13 = vadd.f32 %v660_v12, %v2258_v61  ;;  %v662_v14 = vpop.f32.mrb[1].mxu0  ;;  %v2290_v12 = vpop.permute.xlu0 %540 }
 0x13b   : > { %v663_v16 = vadd.f32 %v662_v14, %v2258_v61  ;;  %v664_v17 = vpop.f32.mrb[2].mxu0 }
 0x13c   : > { %v665_v18 = vadd.f32 %v664_v17, %v2261_v15  ;;  %v666_v19 = vpop.f32.mrb[3].mxu0  ;;  %v739_v22 = vmax.f32 %v661_v13, 0.0 }
 0x13d   : > { %v667_v21 = vadd.f32 %v666_v19, %v2261_v15  ;;  %v740_v24 = vmax.f32 %v663_v16, 0.0 }
 0x13e   : > { %v741_v23 = vmax.f32 %v665_v18, 0.0  ;;  %v2293_v18 = vpop.permute.xlu1 %545 }
 0x13f   : > { %v742_v25 = vmax.f32 %v667_v21, 0.0 }
 0x140   : > { %v771_v26 = vpack.c.bf16 %v741_v23, %v739_v22 }
 0x141   : > { %v670_v27 = vpop.f32.mrb[4].mxu0  ;;  %v772_v28 = vpack.c.bf16 %v742_v25, %v740_v24 }
 0x142   : > { %v671_v29 = vadd.f32 %v670_v27, %v2265_v20  ;;  %v672_v30 = vpop.f32.mrb[5].mxu0 }
 0x143   : > { %v673_v32 = vadd.f32 %v672_v30, %v2265_v20  ;;  %v674_v33 = vpop.f32.mrb[6].mxu0  ;;  %915 = vmatprep.subr.bf16.mxu1 %v772_v28  ;;  %v2298_v30 = vpop.permute.xlu0 %550 }
 0x144   : > { %v675_v34 = vadd.f32 %v674_v33, %v2269_v31  ;;  %v676_v35 = vpop.f32.mrb[7].mxu0  ;;  %916 = vmatpush1.bf16.msra.mxu1 %v771_v26  ;;  %v743_v37 = vmax.f32 %v671_v29, 0.0 }
 0x145   : > { %v677_v36 = vadd.f32 %v676_v35, %v2269_v31  ;;  %v744_v39 = vmax.f32 %v673_v32, 0.0 }
 0x146   : > { %v745_v38 = vmax.f32 %v675_v34, 0.0 }
 0x147   : > { %v746_v40 = vmax.f32 %v677_v36, 0.0  ;;  %v2301_v36 = vpop.permute.xlu1 %555 }
 0x148   : > { %v773_v41 = vpack.c.bf16 %v745_v38, %v743_v37 }
 0x149   : > { %v774_v43 = vpack.c.bf16 %v746_v40, %v744_v39  ;;  %v680_v44 = vpop.f32.mrb[8].mxu0 }
 0x14a   : > { %v681_v45 = vadd.f32 %v680_v44, %v2274_v42  ;;  %v682_v46 = vpop.f32.mrb[9].mxu0 }
 0x14b   : > { %v683_v48 = vadd.f32 %v682_v46, %v2274_v42  ;;  %v684_v49 = vpop.f32.mrb[10].mxu0  ;;  %917 = vmatprep.subr.bf16.mxu1 %v774_v43 }
 0x14c   : > { %v685_v50 = vadd.f32 %v684_v49, %v2277_v47  ;;  %v686_v51 = vpop.f32.mrb[11].mxu0  ;;  %918 = vmatpush1.bf16.msra.mxu1 %v773_v41  ;;  %v747_v53 = vmax.f32 %v681_v45, 0.0  ;;  %v2306_v49 = vpop.permute.xlu0 %560 }
 0x14d   : > { %v687_v52 = vadd.f32 %v686_v51, %v2277_v47  ;;  %v748_v55 = vmax.f32 %v683_v48, 0.0 }
 0x14e   : > { %v749_v54 = vmax.f32 %v685_v50, 0.0 }
 0x14f   : > { %v750_v56 = vmax.f32 %v687_v52, 0.0 }
 0x150   : > { %v775_v57 = vpack.c.bf16 %v749_v54, %v747_v53  ;;  %v2309_v54 = vpop.permute.xlu1 %565 }
 0x151   : > { %v776_v59 = vpack.c.bf16 %v750_v56, %v748_v55  ;;  %v690_v60 = vpop.f32.mrb[12].mxu0 }
 0x152   : > { %v691_v62 = vadd.f32 %v690_v60, %v2282_v58  ;;  %v692_v63 = vpop.f32.mrb[13].mxu0 }
 0x153   : > { %v693_v2 = vadd.f32 %v692_v63, %v2282_v58  ;;  %v694_v3 = vpop.f32.mrb[14].mxu0  ;;  %919 = vmatprep.subr.bf16.mxu1 %v776_v59 }
 0x154   : > { %v695_v4 = vadd.f32 %v694_v3, %v2285_v1  ;;  %v696_v5 = vpop.f32.mrb[15].mxu0  ;;  %920 = vmatpush1.bf16.msra.mxu1 %v775_v57  ;;  %v751_v7 = vmax.f32 %v691_v62, 0.0 }
 0x155   : > { %v697_v6 = vadd.f32 %v696_v5, %v2285_v1  ;;  %v752_v9 = vmax.f32 %v693_v2, 0.0  ;;  %v2314_v5 = vpop.permute.xlu0 %570 }
 0x156   : > { %v753_v8 = vmax.f32 %v695_v4, 0.0 }
 0x157   : > { %v754_v10 = vmax.f32 %v697_v6, 0.0 }
 0x158   : > { %v777_v11 = vpack.c.bf16 %v753_v8, %v751_v7 }
 0x159   : > { %v778_v13 = vpack.c.bf16 %v754_v10, %v752_v9  ;;  %v700_v14 = vpop.f32.mrb[16].mxu0  ;;  %v2317_v10 = vpop.permute.xlu1 %575 }
 0x15a   : > { %v701_v16 = vadd.f32 %v700_v14, %v2290_v12  ;;  %v702_v17 = vpop.f32.mrb[17].mxu0 }
 0x15b   : > { %v703_v19 = vadd.f32 %v702_v17, %v2290_v12  ;;  %v704_v21 = vpop.f32.mrb[18].mxu0  ;;  %921 = vmatprep.subr.bf16.mxu1 %v778_v13 }
 0x15c   : > { %v705_v22 = vadd.f32 %v704_v21, %v2293_v18  ;;  %v706_v23 = vpop.f32.mrb[19].mxu0  ;;  %922 = vmatpush1.bf16.msra.mxu1 %v777_v11  ;;  %v755_v25 = vmax.f32 %v701_v16, 0.0 }
 0x15d   : > { %v707_v24 = vadd.f32 %v706_v23, %v2293_v18  ;;  %v756_v27 = vmax.f32 %v703_v19, 0.0 }
 0x15e   : > { %v757_v26 = vmax.f32 %v705_v22, 0.0 }
 0x15f   : > { %v758_v28 = vmax.f32 %v707_v24, 0.0 }
 0x160   : > { %v779_v29 = vpack.c.bf16 %v757_v26, %v755_v25 }
 0x161   : > { %v780_v32 = vpack.c.bf16 %v758_v28, %v756_v27  ;;  %v710_v33 = vpop.f32.mrb[20].mxu0 }
 0x162   : > { %v711_v34 = vadd.f32 %v710_v33, %v2298_v30  ;;  %v712_v35 = vpop.f32.mrb[21].mxu0  ;;  %v2327_v33 = vld [vmem:[%s2737_s3] sm:$0xff]  }
 0x163   : > { %v713_v37 = vadd.f32 %v712_v35, %v2298_v30  ;;  %v714_v38 = vpop.f32.mrb[22].mxu0  ;;  %923 = vmatprep.subr.bf16.mxu1 %v780_v32 }
 0x164   : > { %v715_v39 = vadd.f32 %v714_v38, %v2301_v36  ;;  %v716_v40 = vpop.f32.mrb[23].mxu0  ;;  %924 = vmatpush1.bf16.msra.mxu1 %v779_v29  ;;  %v759_v43 = vmax.f32 %v711_v34, 0.0 }
 0x165   : > { %v717_v41 = vadd.f32 %v716_v40, %v2301_v36  ;;  %v760_v45 = vmax.f32 %v713_v37, 0.0 }
 0x166   : > { %v761_v44 = vmax.f32 %v715_v39, 0.0 }
 0x167   : > { %v762_v46 = vmax.f32 %v717_v41, 0.0 }
 0x168   : > { %v781_v48 = vpack.c.bf16 %v761_v44, %v759_v43 }
 0x169   : > { %v782_v50 = vpack.c.bf16 %v762_v46, %v760_v45  ;;  %v720_v51 = vpop.f32.mrb[24].mxu0 }
 0x16a   : > { %v721_v52 = vadd.f32 %v720_v51, %v2306_v49  ;;  %v722_v53 = vpop.f32.mrb[25].mxu0 }
 0x16b   : > { %v723_v55 = vadd.f32 %v722_v53, %v2306_v49  ;;  %v724_v56 = vpop.f32.mrb[26].mxu0  ;;  %925 = vmatprep.subr.bf16.mxu1 %v782_v50 }
 0x16c   : > { %v725_v57 = vadd.f32 %v724_v56, %v2309_v54  ;;  %v726_v59 = vpop.f32.mrb[27].mxu0  ;;  %926 = vmatpush1.bf16.msra.mxu1 %v781_v48  ;;  %v763_v62 = vmax.f32 %v721_v52, 0.0 }
 0x16d   : > { %v727_v60 = vadd.f32 %v726_v59, %v2309_v54  ;;  %v764_v2 = vmax.f32 %v723_v55, 0.0 }
 0x16e   : > { %v765_v63 = vmax.f32 %v725_v57, 0.0 }
 0x16f   : > { %v766_v3 = vmax.f32 %v727_v60, 0.0 }
 0x170   : > { %v783_v4 = vpack.c.bf16 %v765_v63, %v763_v62 }
 0x171   : > { %v784_v6 = vpack.c.bf16 %v766_v3, %v764_v2  ;;  %v730_v7 = vpop.f32.mrb[28].mxu0 }
 0x172   : > { %v731_v8 = vadd.f32 %v730_v7, %v2314_v5  ;;  %v732_v9 = vpop.f32.mrb[29].mxu0 }
 0x173   : > { %v733_v11 = vadd.f32 %v732_v9, %v2314_v5  ;;  %v734_v13 = vpop.f32.mrb[30].mxu0  ;;  %927 = vmatprep.subr.bf16.mxu1 %v784_v6 }
 0x174   : > { %v735_v14 = vadd.f32 %v734_v13, %v2317_v10  ;;  %v736_v16 = vpop.f32.mrb[31].mxu0  ;;  %928 = vmatpush1.bf16.msra.mxu1 %v783_v4  ;;  %v767_v19 = vmax.f32 %v731_v8, 0.0 }
 0x175   : > { %v737_v17 = vadd.f32 %v736_v16, %v2317_v10  ;;  %v768_v22 = vmax.f32 %v733_v11, 0.0 }
 0x176   : > { %v769_v21 = vmax.f32 %v735_v14, 0.0 }
 0x177   : > { %v770_v23 = vmax.f32 %v737_v17, 0.0 }
 0x178   : > { %v785_v24 = vpack.c.bf16 %v769_v21, %v767_v19 }
 0x179   : > { %v786_v25 = vpack.c.bf16 %v770_v23, %v768_v22  ;;  %v1142_v26 = vpop.f32.mrb[32].mxu0 }
 0x17a   : > { %v1143_v27 = vadd.f32 %v1142_v26, %v2258_v61  ;;  %v1144_v28 = vpop.f32.mrb[33].mxu0 }
 0x17b   : > { %v1145_v29 = vadd.f32 %v1144_v28, %v2258_v61  ;;  %929 = vmatprep.subr.bf16.mxu1 %v786_v25  ;;  %v1146_v32 = vpop.f32.mrb[34].mxu0 }
 0x17c   : > { %v1147_v34 = vadd.f32 %v1146_v32, %v2261_v15  ;;  %930 = vmatpush1.bf16.msra.mxu1 %v785_v24  ;;  %v1148_v35 = vpop.f32.mrb[35].mxu0  ;;  %v1221_v38 = vmax.f32 %v1143_v27, 0.0 }
 0x17d   : > { %v1149_v37 = vadd.f32 %v1148_v35, %v2261_v15  ;;  %v1222_v40 = vmax.f32 %v1145_v29, 0.0  ;;  %v2338_v15 = vld [vmem:[%s2737_s3 + $0x8] sm:$0xff]  }
 0x17e   : > { %v1223_v39 = vmax.f32 %v1147_v34, 0.0 }
 0x17f   : > { %v1224_v41 = vmax.f32 %v1149_v37, 0.0  ;;  %948 = vmatmul.mubr.bf16.vlgmr.msra.gmra.mrb[0].mxu1 %v2327_v33 }
 0x180   : > { %v1253_v61 = vpack.c.bf16 %v1223_v39, %v1221_v38  ;;  %957 = vmatprep.mubr.bf16.mxu1 %v1807_v0 }
 0x181   : > { %v1254_v43 = vpack.c.bf16 %v1224_v41, %v1222_v40  ;;  %v1152_v44 = vpop.f32.mrb[36].mxu0 }
 0x182   : > { %v1153_v45 = vadd.f32 %v1152_v44, %v2265_v20  ;;  %v1154_v46 = vpop.f32.mrb[37].mxu0 }
 0x183   : > { %v1155_v48 = vadd.f32 %v1154_v46, %v2265_v20  ;;  %v1156_v50 = vpop.f32.mrb[38].mxu0  ;;  %1269 = vmatprep.subr.bf16.mxu1 %v1254_v43 }
 0x184   : > { %v1157_v51 = vadd.f32 %v1156_v50, %v2269_v31  ;;  %v1158_v52 = vpop.f32.mrb[39].mxu0  ;;  %1270 = vmatpush1.bf16.msra.mxu1 %v1253_v61  ;;  %v1225_v55 = vmax.f32 %v1153_v45, 0.0 }
 0x185   : > { %v1159_v53 = vadd.f32 %v1158_v52, %v2269_v31  ;;  %v1226_v57 = vmax.f32 %v1155_v48, 0.0  ;;  %v2349_v31 = vld [vmem:[%s2737_s3 + $0x10] sm:$0xff]  }
 0x186   : > { %v1227_v56 = vmax.f32 %v1157_v51, 0.0 }
 0x187   : > { %v1228_v59 = vmax.f32 %v1159_v53, 0.0  ;;  %958 = vmatmul.mubr.bf16.gmra.mrb[4].mxu1 %v2338_v15 }
 0x188   : > { %v1255_v20 = vpack.c.bf16 %v1227_v56, %v1225_v55  ;;  %967 = vmatprep.mubr.bf16.mxu1 %v1807_v0 }
 0x189   : > { %v1256_v60 = vpack.c.bf16 %v1228_v59, %v1226_v57  ;;  %v1162_v62 = vpop.f32.mrb[40].mxu0 }
 0x18a   : > { %v1163_v63 = vadd.f32 %v1162_v62, %v2274_v42  ;;  %v1164_v2 = vpop.f32.mrb[41].mxu0 }
 0x18b   : > { %v1165_v3 = vadd.f32 %v1164_v2, %v2274_v42  ;;  %v1166_v4 = vpop.f32.mrb[42].mxu0  ;;  %1271 = vmatprep.subr.bf16.mxu1 %v1256_v60 }
 0x18c   : > { %v1167_v6 = vadd.f32 %v1166_v4, %v2277_v47  ;;  %v1168_v7 = vpop.f32.mrb[43].mxu0  ;;  %1272 = vmatpush1.bf16.msra.mxu1 %v1255_v20  ;;  %v1229_v9 = vmax.f32 %v1163_v63, 0.0 }
 0x18d   : > { %v1169_v8 = vadd.f32 %v1168_v7, %v2277_v47  ;;  %v1230_v13 = vmax.f32 %v1165_v3, 0.0  ;;  %v2360_v47 = vld [vmem:[%s2737_s3 + $0x18] sm:$0xff]  }
 0x18e   : > { %v1231_v11 = vmax.f32 %v1167_v6, 0.0 }
 0x18f   : > { %v1232_v14 = vmax.f32 %v1169_v8, 0.0  ;;  %968 = vmatmul.mubr.bf16.gmra.mrb[8].mxu1 %v2349_v31 }
 0x190   : > { %v1257_v42 = vpack.c.bf16 %v1231_v11, %v1229_v9  ;;  %977 = vmatprep.mubr.bf16.mxu1 %v1807_v0 }
 0x191   : > { %v1258_v16 = vpack.c.bf16 %v1232_v14, %v1230_v13  ;;  %v1172_v17 = vpop.f32.mrb[44].mxu0 }
 0x192   : > { %v1173_v19 = vadd.f32 %v1172_v17, %v2282_v58  ;;  %v1174_v21 = vpop.f32.mrb[45].mxu0 }
 0x193   : > { %v1175_v22 = vadd.f32 %v1174_v21, %v2282_v58  ;;  %v1176_v23 = vpop.f32.mrb[46].mxu0  ;;  %1273 = vmatprep.subr.bf16.mxu1 %v1258_v16 }
 0x194   : > { %v1177_v24 = vadd.f32 %v1176_v23, %v2285_v1  ;;  %v1178_v25 = vpop.f32.mrb[47].mxu0  ;;  %1274 = vmatpush1.bf16.msra.mxu1 %v1257_v42  ;;  %v1233_v27 = vmax.f32 %v1173_v19, 0.0 }
 0x195   : > { %v1179_v26 = vadd.f32 %v1178_v25, %v2285_v1  ;;  %v1234_v29 = vmax.f32 %v1175_v22, 0.0  ;;  %v2371_v1 = vld [vmem:[%s2737_s3 + $0x20] sm:$0xff]  }
 0x196   : > { %v1235_v28 = vmax.f32 %v1177_v24, 0.0 }
 0x197   : > { %v1236_v32 = vmax.f32 %v1179_v26, 0.0  ;;  %978 = vmatmul.mubr.bf16.gmra.mrb[12].mxu1 %v2360_v47 }
 0x198   : > { %v1259_v58 = vpack.c.bf16 %v1235_v28, %v1233_v27  ;;  %987 = vmatprep.mubr.bf16.mxu1 %v1807_v0 }
 0x199   : > { %v1260_v34 = vpack.c.bf16 %v1236_v32, %v1234_v29  ;;  %v1182_v35 = vpop.f32.mrb[48].mxu0 }
 0x19a   : > { %v1183_v37 = vadd.f32 %v1182_v35, %v2290_v12  ;;  %v1184_v38 = vpop.f32.mrb[49].mxu0 }
 0x19b   : > { %v1185_v39 = vadd.f32 %v1184_v38, %v2290_v12  ;;  %v1186_v40 = vpop.f32.mrb[50].mxu0  ;;  %1275 = vmatprep.subr.bf16.mxu1 %v1260_v34 }
 0x19c   : > { %v1187_v41 = vadd.f32 %v1186_v40, %v2293_v18  ;;  %v1188_v61 = vpop.f32.mrb[51].mxu0  ;;  %1276 = vmatpush1.bf16.msra.mxu1 %v1259_v58  ;;  %v1237_v44 = vmax.f32 %v1183_v37, 0.0 }
 0x19d   : > { %v1189_v43 = vadd.f32 %v1188_v61, %v2293_v18  ;;  %v1238_v46 = vmax.f32 %v1185_v39, 0.0  ;;  %v1748_v18 = vld [vmem:[%s2737_s3 + $0x28] sm:$0xff]  }
 0x19e   : > { %v1239_v45 = vmax.f32 %v1187_v41, 0.0 }
 0x19f   : > { %v1240_v48 = vmax.f32 %v1189_v43, 0.0  ;;  %988 = vmatmul.mubr.bf16.gmra.mrb[16].mxu1 %v2371_v1 }
 0x1a0   : > { %v1261_v12 = vpack.c.bf16 %v1239_v45, %v1237_v44  ;;  %997 = vmatprep.mubr.bf16.mxu1 %v1807_v0 }
 0x1a1   : > { %v1262_v50 = vpack.c.bf16 %v1240_v48, %v1238_v46  ;;  %v1192_v51 = vpop.f32.mrb[52].mxu0 }
 0x1a2   : > { %v1193_v52 = vadd.f32 %v1192_v51, %v2298_v30  ;;  %v1194_v53 = vpop.f32.mrb[53].mxu0 }
 0x1a3   : > { %v1195_v55 = vadd.f32 %v1194_v53, %v2298_v30  ;;  %v1196_v56 = vpop.f32.mrb[54].mxu0  ;;  %1277 = vmatprep.subr.bf16.mxu1 %v1262_v50 }
 0x1a4   : > { %v1197_v57 = vadd.f32 %v1196_v56, %v2301_v36  ;;  %v1198_v59 = vpop.f32.mrb[55].mxu0  ;;  %1278 = vmatpush1.bf16.msra.mxu1 %v1261_v12  ;;  %v1241_v60 = vmax.f32 %v1193_v52, 0.0 }
 0x1a5   : > { %v1199_v20 = vadd.f32 %v1198_v59, %v2301_v36  ;;  %v1242_v63 = vmax.f32 %v1195_v55, 0.0  ;;  %v1749_v36 = vld [vmem:[%s2737_s3 + $0x30] sm:$0xff]  }
 0x1a6   : > { %v1243_v62 = vmax.f32 %v1197_v57, 0.0 }
 0x1a7   : > { %v1244_v2 = vmax.f32 %v1199_v20, 0.0  ;;  %998 = vmatmul.mubr.bf16.gmra.mrb[20].mxu1 %v1748_v18 }
 0x1a8   : > { %v1263_v3 = vpack.c.bf16 %v1243_v62, %v1241_v60  ;;  %1007 = vmatprep.mubr.bf16.mxu1 %v1807_v0 }
 0x1a9   : > { %v1264_v30 = vpack.c.bf16 %v1244_v2, %v1242_v63  ;;  %v1202_v4 = vpop.f32.mrb[56].mxu0 }
 0x1aa   : > { %v1203_v6 = vadd.f32 %v1202_v4, %v2306_v49  ;;  %v1204_v7 = vpop.f32.mrb[57].mxu0 }
 0x1ab   : > { %v1205_v8 = vadd.f32 %v1204_v7, %v2306_v49  ;;  %v1206_v9 = vpop.f32.mrb[58].mxu0  ;;  %1279 = vmatprep.subr.bf16.mxu1 %v1264_v30 }
 0x1ac   : > { %v1207_v11 = vadd.f32 %v1206_v9, %v2309_v54  ;;  %v1208_v13 = vpop.f32.mrb[59].mxu0  ;;  %1280 = vmatpush1.bf16.msra.mxu1 %v1263_v3  ;;  %v1245_v42 = vmax.f32 %v1203_v6, 0.0 }
 0x1ad   : > { %v1209_v14 = vadd.f32 %v1208_v13, %v2309_v54  ;;  %v1246_v17 = vmax.f32 %v1205_v8, 0.0  ;;  %v1750_v54 = vld [vmem:[%s2737_s3 + $0x38] sm:$0xff]  }
 0x1ae   : > { %v1247_v16 = vmax.f32 %v1207_v11, 0.0 }
 0x1af   : > { %v1248_v19 = vmax.f32 %v1209_v14, 0.0  ;;  %1008 = vmatmul.mubr.bf16.gmra.mrb[24].mxu1 %v1749_v36 }
 0x1b0   : > { %v1265_v21 = vpack.c.bf16 %v1247_v16, %v1245_v42  ;;  %1017 = vmatprep.mubr.bf16.mxu1 %v1807_v0 }
 0x1b1   : > { %v1266_v49 = vpack.c.bf16 %v1248_v19, %v1246_v17  ;;  %v1212_v22 = vpop.f32.mrb[60].mxu0 }
 0x1b2   : > { %v1213_v23 = vadd.f32 %v1212_v22, %v2314_v5  ;;  %v1214_v24 = vpop.f32.mrb[61].mxu0 }
 0x1b3   : > { %v1215_v25 = vadd.f32 %v1214_v24, %v2314_v5  ;;  %v1216_v26 = vpop.f32.mrb[62].mxu0  ;;  %1281 = vmatprep.subr.bf16.mxu1 %v1266_v49 }
 0x1b4   : > { %v1217_v27 = vadd.f32 %v1216_v26, %v2317_v10  ;;  %v1218_v28 = vpop.f32.mrb[63].mxu0  ;;  %1282 = vmatpush1.bf16.msra.mxu1 %v1265_v21  ;;  %v1249_v32 = vmax.f32 %v1213_v23, 0.0 }
 0x1b5   : > { %v1219_v29 = vadd.f32 %v1218_v28, %v2317_v10  ;;  %v1250_v34 = vmax.f32 %v1215_v25, 0.0  ;;  %v2413_v10 = vpop.permute.xlu0 %789 }
 0x1b6   : > { %v1251_v58 = vmax.f32 %v1217_v27, 0.0 }
 0x1b7   : > { %v1252_v35 = vmax.f32 %v1219_v29, 0.0  ;;  %1018 = vmatmul.mubr.bf16.gmra.mrb[28].mxu1 %v1750_v54 }
 0x1b8   : > { %v1267_v37 = vpack.c.bf16 %v1251_v58, %v1249_v32  ;;  %1301 = vmatprep.mubr.bf16.mxu1 %v1807_v0 }
 0x1b9   : > { %v1268_v5 = vpack.c.bf16 %v1252_v35, %v1250_v34  ;;  %v2428_v41 = vpop.permute.xlu0 %799 }
 0x1bb   : > { %1283 = vmatprep.subr.bf16.mxu1 %v1268_v5 }
 0x1bc   : > { %1284 = vmatpush1.bf16.msra.mxu1 %v1267_v37 }
 0x1bd   : > { %v2440_v52 = vpop.permute.xlu0 %809 }
 0x1bf   : > { %1302 = vmatmul.mubr.bf16.vlgmr.msra.gmra.mrb[32].mxu1 %v2327_v33 }
 0x1c0   : > { %1311 = vmatprep.mubr.bf16.mxu1 %v1807_v0 }
 0x1c1   : > { %v2452_v63 = vpop.permute.xlu0 %819 }
 0x1c5   : > { %v2464_v11 = vpop.permute.xlu0 %829 }
 0x1c7   : > { %1312 = vmatmul.mubr.bf16.gmra.mrb[36].mxu1 %v2338_v15 }
 0x1c8   : > { %1321 = vmatprep.mubr.bf16.mxu1 %v1807_v0 }
 0x1c9   : > { %v2476_v23 = vpop.permute.xlu0 %839 }
 0x1cd   : > { %v2488_v34 = vpop.permute.xlu0 %849 }
 0x1cf   : > { %1322 = vmatmul.mubr.bf16.gmra.mrb[40].mxu1 %v2349_v31 }
 0x1d0   : > { %1331 = vmatprep.mubr.bf16.mxu1 %v1807_v0 }
 0x1d7   : > { %1332 = vmatmul.mubr.bf16.gmra.mrb[44].mxu1 %v2360_v47  ;;  %v2416_v47 = vpop.permute.xlu1 %794 }
 0x1d8   : > { %1341 = vmatprep.mubr.bf16.mxu1 %v1807_v0 }
 0x1db   : > { %v2431_v45 = vpop.permute.xlu1 %804 }
 0x1df   : > { %1342 = vmatmul.mubr.bf16.gmra.mrb[48].mxu1 %v2371_v1 }
 0x1e0   : > { %1351 = vmatprep.mubr.bf16.mxu1 %v1807_v0 }
 0x1e7   : > { %1352 = vmatmul.mubr.bf16.gmra.mrb[52].mxu1 %v1748_v18  ;;  %v2443_v18 = vpop.permute.xlu1 %814 }
 0x1e8   : > { %1361 = vmatprep.mubr.bf16.mxu1 %v1807_v0 }
 0x1eb   : > { %v2455_v4 = vpop.permute.xlu1 %824 }
 0x1ef   : > { %1362 = vmatmul.mubr.bf16.gmra.mrb[56].mxu1 %v1749_v36  ;;  %v2467_v16 = vpop.permute.xlu1 %834 }
 0x1f0   : > { %1371 = vmatprep.mubr.bf16.mxu1 %v1807_v0 }
 0x1f7   : > { %1372 = vmatmul.mubr.bf16.gmra.mrb[60].mxu1 %v1750_v54  ;;  %v2479_v54 = vpop.permute.xlu1 %844 }
 0x252   : > { %v949_v33 = vpop.f32.mrb[0].mxu1 }
 0x253   : > { %v950_v15 = vadd.f32 %v949_v33, %v2413_v10  ;;  %v951_v31 = vpop.f32.mrb[1].mxu1  ;;  %v2491_v33 = vpop.permute.xlu1 %854 }
 0x254   : > { %v952_v38 = vadd.f32 %v951_v31, %v2413_v10  ;;  %v953_v39 = vpop.f32.mrb[2].mxu1 }
 0x255   : > { %1028 = vst [vmem:[%s2420_s7] sm:$0xff] %v950_v15  ;;  %v954_v0 = vadd.f32 %v953_v39, %v2416_v47  ;;  %v955_v40 = vpop.f32.mrb[3].mxu1 }
 0x256   : > { %1029 = vst [vmem:[%s2420_s7 + $0x8] sm:$0xff] %v952_v38  ;;  %v956_v1 = vadd.f32 %v955_v40, %v2416_v47  ;;  %v2500_v40 = vpop.permute.xlu0 %859 }
 0x257   : > { %1030 = vst [vmem:[%s2420_s7 + $0x20] sm:$0xff] %v954_v0 }
 0x258   : > { %1031 = vst [vmem:[%s2420_s7 + $0x28] sm:$0xff] %v956_v1 }
 0x25a   : > { %v959_v61 = vpop.f32.mrb[4].mxu1 }
 0x25b   : > { %v960_v43 = vadd.f32 %v959_v61, %v2428_v41  ;;  %v961_v44 = vpop.f32.mrb[5].mxu1 }
 0x25c   : > { %v962_v46 = vadd.f32 %v961_v44, %v2428_v41  ;;  %v963_v48 = vpop.f32.mrb[6].mxu1  ;;  %v2503_v44 = vpop.permute.xlu1 %864 }
 0x25d   : > { %1032 = vst [vmem:[%s2420_s7 + $0x40] sm:$0xff] %v960_v43  ;;  %v964_v12 = vadd.f32 %v963_v48, %v2431_v45  ;;  %v965_v50 = vpop.f32.mrb[7].mxu1 }
 0x25e   : > { %1033 = vst [vmem:[%s2420_s7 + $0x48] sm:$0xff] %v962_v46  ;;  %v966_v51 = vadd.f32 %v965_v50, %v2431_v45 }
 0x25f   : > { %1034 = vst [vmem:[%s2420_s7 + $0x60] sm:$0xff] %v964_v12 }
 0x260   : > { %1035 = vst [vmem:[%s2420_s7 + $0x68] sm:$0xff] %v966_v51 }
 0x262   : > { %v969_v53 = vpop.f32.mrb[8].mxu1 }
 0x263   : > { %v970_v55 = vadd.f32 %v969_v53, %v2440_v52  ;;  %v971_v56 = vpop.f32.mrb[9].mxu1 }
 0x264   : > { %v972_v57 = vadd.f32 %v971_v56, %v2440_v52  ;;  %v973_v59 = vpop.f32.mrb[10].mxu1 }
 0x265   : > { %1036 = vst [vmem:[%s2420_s7 + $0x80] sm:$0xff] %v970_v55  ;;  %v974_v20 = vadd.f32 %v973_v59, %v2443_v18  ;;  %v975_v60 = vpop.f32.mrb[11].mxu1 }
 0x266   : > { %1037 = vst [vmem:[%s2420_s7 + $0x88] sm:$0xff] %v972_v57  ;;  %v976_v62 = vadd.f32 %v975_v60, %v2443_v18 }
 0x267   : > { %1038 = vst [vmem:[%s2420_s7 + $0xa0] sm:$0xff] %v974_v20 }
 0x268   : > { %1039 = vst [vmem:[%s2420_s7 + $0xa8] sm:$0xff] %v976_v62 }
 0x26a   : > { %v979_v2 = vpop.f32.mrb[12].mxu1 }
 0x26b   : > { %v980_v3 = vadd.f32 %v979_v2, %v2452_v63  ;;  %v981_v30 = vpop.f32.mrb[13].mxu1 }
 0x26c   : > { %v982_v6 = vadd.f32 %v981_v30, %v2452_v63  ;;  %v983_v7 = vpop.f32.mrb[14].mxu1 }
 0x26d   : > { %1040 = vst [vmem:[%s2420_s7 + $0xc0] sm:$0xff] %v980_v3  ;;  %v984_v8 = vadd.f32 %v983_v7, %v2455_v4  ;;  %v985_v9 = vpop.f32.mrb[15].mxu1 }
 0x26e   : > { %1041 = vst [vmem:[%s2420_s7 + $0xc8] sm:$0xff] %v982_v6  ;;  %v986_v36 = vadd.f32 %v985_v9, %v2455_v4 }
 0x26f   : > { %1042 = vst [vmem:[%s2420_s7 + $0xe0] sm:$0xff] %v984_v8 }
 0x270   : > { %1043 = vst [vmem:[%s2420_s7 + $0xe8] sm:$0xff] %v986_v36 }
 0x272   : > { %v989_v13 = vpop.f32.mrb[16].mxu1 }
 0x273   : > { %v990_v14 = vadd.f32 %v989_v13, %v2464_v11  ;;  %v991_v42 = vpop.f32.mrb[17].mxu1 }
 0x274   : > { %v992_v17 = vadd.f32 %v991_v42, %v2464_v11  ;;  %v993_v19 = vpop.f32.mrb[18].mxu1 }
 0x275   : > { %1044 = vst [vmem:[%s2420_s7 + $0x100] sm:$0xff] %v990_v14  ;;  %v994_v21 = vadd.f32 %v993_v19, %v2467_v16  ;;  %v995_v49 = vpop.f32.mrb[19].mxu1 }
 0x276   : > { %1045 = vst [vmem:[%s2420_s7 + $0x108] sm:$0xff] %v992_v17  ;;  %v996_v22 = vadd.f32 %v995_v49, %v2467_v16 }
 0x277   : > { %1046 = vst [vmem:[%s2420_s7 + $0x120] sm:$0xff] %v994_v21 }
 0x278   : > { %1047 = vst [vmem:[%s2420_s7 + $0x128] sm:$0xff] %v996_v22 }
 0x27a   : > { %v999_v24 = vpop.f32.mrb[20].mxu1 }
 0x27b   : > { %v1000_v25 = vadd.f32 %v999_v24, %v2476_v23  ;;  %v1001_v26 = vpop.f32.mrb[21].mxu1 }
 0x27c   : > { %v1002_v27 = vadd.f32 %v1001_v26, %v2476_v23  ;;  %v1003_v28 = vpop.f32.mrb[22].mxu1 }
 0x27d   : > { %1048 = vst [vmem:[%s2420_s7 + $0x140] sm:$0xff] %v1000_v25  ;;  %v1004_v29 = vadd.f32 %v1003_v28, %v2479_v54  ;;  %v1005_v32 = vpop.f32.mrb[23].mxu1 }
 0x27e   : > { %1049 = vst [vmem:[%s2420_s7 + $0x148] sm:$0xff] %v1002_v27  ;;  %v1006_v58 = vadd.f32 %v1005_v32, %v2479_v54 }
 0x27f   : > { %1050 = vst [vmem:[%s2420_s7 + $0x160] sm:$0xff] %v1004_v29 }
 0x280   : > { %1051 = vst [vmem:[%s2420_s7 + $0x168] sm:$0xff] %v1006_v58 }
 0x282   : > { %v1009_v35 = vpop.f32.mrb[24].mxu1 }
 0x283   : > { %v1010_v37 = vadd.f32 %v1009_v35, %v2488_v34  ;;  %v1011_v5 = vpop.f32.mrb[25].mxu1 }
 0x284   : > { %v1012_v15 = vadd.f32 %v1011_v5, %v2488_v34  ;;  %v1013_v31 = vpop.f32.mrb[26].mxu1 }
 0x285   : > { %1052 = vst [vmem:[%s2420_s7 + $0x180] sm:$0xff] %v1010_v37  ;;  %v1014_v38 = vadd.f32 %v1013_v31, %v2491_v33  ;;  %v1015_v39 = vpop.f32.mrb[27].mxu1 }
 0x286   : > { %1053 = vst [vmem:[%s2420_s7 + $0x188] sm:$0xff] %v1012_v15  ;;  %v1016_v0 = vadd.f32 %v1015_v39, %v2491_v33 }
 0x287   : > { %1054 = vst [vmem:[%s2420_s7 + $0x1a0] sm:$0xff] %v1014_v38 }
 0x288   : > { %1055 = vst [vmem:[%s2420_s7 + $0x1a8] sm:$0xff] %v1016_v0 }
 0x28a   : > { %v1019_v1 = vpop.f32.mrb[28].mxu1 }
 0x28b   : > { %v1020_v61 = vadd.f32 %v1019_v1, %v2500_v40  ;;  %v1021_v43 = vpop.f32.mrb[29].mxu1 }
 0x28c   : > { %v1022_v46 = vadd.f32 %v1021_v43, %v2500_v40  ;;  %v1023_v48 = vpop.f32.mrb[30].mxu1 }
 0x28d   : > { %1056 = vst [vmem:[%s2420_s7 + $0x1c0] sm:$0xff] %v1020_v61  ;;  %v1024_v12 = vadd.f32 %v1023_v48, %v2503_v44  ;;  %v1025_v50 = vpop.f32.mrb[31].mxu1 }
 0x28e   : > { %1057 = vst [vmem:[%s2420_s7 + $0x1c8] sm:$0xff] %v1022_v46  ;;  %v1026_v51 = vadd.f32 %v1025_v50, %v2503_v44 }
 0x28f   : > { %1058 = vst [vmem:[%s2420_s7 + $0x1e0] sm:$0xff] %v1024_v12 }
 0x290   : > { %1059 = vst [vmem:[%s2420_s7 + $0x1e8] sm:$0xff] %v1026_v51 }
 0x292   : > { %v1303_v53 = vpop.f32.mrb[32].mxu1 }
 0x293   : > { %v1304_v55 = vadd.f32 %v1303_v53, %v2413_v10  ;;  %v1305_v56 = vpop.f32.mrb[33].mxu1 }
 0x294   : > { %v1306_v57 = vadd.f32 %v1305_v56, %v2413_v10  ;;  %v1307_v59 = vpop.f32.mrb[34].mxu1 }
 0x295   : > { %1382 = vst [vmem:[%s2420_s7 + $0x10] sm:$0xff] %v1304_v55  ;;  %v1308_v20 = vadd.f32 %v1307_v59, %v2416_v47  ;;  %v1309_v60 = vpop.f32.mrb[35].mxu1  ;;  %v1446_v59 = vld [vmem:[%s2420_s7 + $0x20] sm:$0xff] (%p1886_p6) }
 0x296   : > { %1383 = vst [vmem:[%s2420_s7 + $0x18] sm:$0xff] %v1306_v57  ;;  %v1310_v62 = vadd.f32 %v1309_v60, %v2416_v47  ;;  %1447 = vst [vmem:[%s2592_s13 + $0x40] sm:$0xff] (%p1886_p6), %v1446_v59 }
 0x297   : > { %1384 = vst [vmem:[%s2420_s7 + $0x30] sm:$0xff] %v1308_v20  ;;  %v1448_v20 = vld [vmem:[%s2420_s7 + $0x28] sm:$0xff] (%p1886_p6) }
 0x298   : > { %1385 = vst [vmem:[%s2420_s7 + $0x38] sm:$0xff] %v1310_v62  ;;  %1449 = vst [vmem:[%s2592_s13 + $0x48] sm:$0xff] (%p1886_p6), %v1448_v20 }
 0x29a   : > { %v1313_v2 = vpop.f32.mrb[36].mxu1 }
 0x29b   : > { %v1314_v3 = vadd.f32 %v1313_v2, %v2428_v41  ;;  %v1315_v30 = vpop.f32.mrb[37].mxu1  ;;  %v1454_v2 = vld [vmem:[%s2420_s7 + $0x40] sm:$0xff] (%p1886_p6) }
 0x29c   : > { %v1316_v10 = vadd.f32 %v1315_v30, %v2428_v41  ;;  %v1317_v6 = vpop.f32.mrb[38].mxu1  ;;  %1455 = vst [vmem:[%s2592_s13 + $0x80] sm:$0xff] (%p1886_p6), %v1454_v2 }
 0x29d   : > { %1386 = vst [vmem:[%s2420_s7 + $0x50] sm:$0xff] %v1314_v3  ;;  %v1318_v7 = vadd.f32 %v1317_v6, %v2431_v45  ;;  %v1319_v8 = vpop.f32.mrb[39].mxu1  ;;  %v1444_v57 = vld [vmem:[%s2420_s7 + $0x18] sm:$0xff] (%p1886_p6)  ;;  %v1456_v3 = vld [vmem:[%s2420_s7 + $0x48] sm:$0xff] (%p1886_p6)  ;;  %v1462_v6 = vld [vmem:[%s2420_s7 + $0x60] sm:$0xff] (%p1886_p6) }
 0x29e   : > { %1387 = vst [vmem:[%s2420_s7 + $0x58] sm:$0xff] %v1316_v10  ;;  %v1320_v47 = vadd.f32 %v1319_v8, %v2431_v45  ;;  %v1450_v60 = vld [vmem:[%s2420_s7 + $0x30] sm:$0xff] (%p1886_p6)  ;;  %1445 = vst [vmem:[%s2592_s13 + $0x18] sm:$0xff] (%p1886_p6), %v1444_v57 }
 0x29f   : > { %1388 = vst [vmem:[%s2420_s7 + $0x70] sm:$0xff] %v1318_v7  ;;  %v1452_v62 = vld [vmem:[%s2420_s7 + $0x38] sm:$0xff] (%p1886_p6)  ;;  %1451 = vst [vmem:[%s2592_s13 + $0x50] sm:$0xff] (%p1886_p6), %v1450_v60  ;;  %v1464_v7 = vld [vmem:[%s2420_s7 + $0x68] sm:$0xff] (%p1886_p6) }
 0x2a0   : > { %1389 = vst [vmem:[%s2420_s7 + $0x78] sm:$0xff] %v1320_v47  ;;  %1453 = vst [vmem:[%s2592_s13 + $0x58] sm:$0xff] (%p1886_p6), %v1452_v62 }
 0x2a1   : > { %1457 = vst [vmem:[%s2592_s13 + $0x88] sm:$0xff] (%p1886_p6), %v1456_v3  ;;  %1463 = vst [vmem:[%s2592_s13 + $0xc0] sm:$0xff] (%p1886_p6), %v1462_v6 }
 0x2a2   : > { %v1323_v9 = vpop.f32.mrb[40].mxu1  ;;  %1465 = vst [vmem:[%s2592_s13 + $0xc8] sm:$0xff] (%p1886_p6), %v1464_v7 }
 0x2a3   : > { %v1324_v36 = vadd.f32 %v1323_v9, %v2440_v52  ;;  %v1325_v13 = vpop.f32.mrb[41].mxu1  ;;  %v1470_v9 = vld [vmem:[%s2420_s7 + $0x80] sm:$0xff] (%p1886_p6) }
 0x2a4   : > { %v1326_v41 = vadd.f32 %v1325_v13, %v2440_v52  ;;  %v1327_v14 = vpop.f32.mrb[42].mxu1  ;;  %v1458_v30 = vld [vmem:[%s2420_s7 + $0x50] sm:$0xff] (%p1886_p6)  ;;  %1471 = vst [vmem:[%s2592_s13 + $0x100] sm:$0xff] (%p1886_p6), %v1470_v9 }
 0x2a5   : > { %1390 = vst [vmem:[%s2420_s7 + $0x90] sm:$0xff] %v1324_v36  ;;  %v1328_v42 = vadd.f32 %v1327_v14, %v2443_v18  ;;  %v1329_v17 = vpop.f32.mrb[43].mxu1  ;;  %v1460_v10 = vld [vmem:[%s2420_s7 + $0x58] sm:$0xff] (%p1886_p6)  ;;  %1459 = vst [vmem:[%s2592_s13 + $0x90] sm:$0xff] (%p1886_p6), %v1458_v30  ;;  %v1472_v36 = vld [vmem:[%s2420_s7 + $0x88] sm:$0xff] (%p1886_p6) }
 0x2a6   : > { %1391 = vst [vmem:[%s2420_s7 + $0x98] sm:$0xff] %v1326_v41  ;;  %v1330_v45 = vadd.f32 %v1329_v17, %v2443_v18  ;;  %1461 = vst [vmem:[%s2592_s13 + $0x98] sm:$0xff] (%p1886_p6), %v1460_v10  ;;  %v1466_v8 = vld [vmem:[%s2420_s7 + $0x70] sm:$0xff] (%p1886_p6)  ;;  %v1478_v14 = vld [vmem:[%s2420_s7 + $0xa0] sm:$0xff] (%p1886_p6) }
 0x2a7   : > { %1392 = vst [vmem:[%s2420_s7 + $0xb0] sm:$0xff] %v1328_v42  ;;  %1467 = vst [vmem:[%s2592_s13 + $0xd0] sm:$0xff] (%p1886_p6), %v1466_v8  ;;  %v1468_v47 = vld [vmem:[%s2420_s7 + $0x78] sm:$0xff] (%p1886_p6)  ;;  %v1480_v42 = vld [vmem:[%s2420_s7 + $0xa8] sm:$0xff] (%p1886_p6) }
 0x2a8   : > { %1393 = vst [vmem:[%s2420_s7 + $0xb8] sm:$0xff] %v1330_v45  ;;  %1469 = vst [vmem:[%s2592_s13 + $0xd8] sm:$0xff] (%p1886_p6), %v1468_v47 }
 0x2a9   : > { %1473 = vst [vmem:[%s2592_s13 + $0x108] sm:$0xff] (%p1886_p6), %v1472_v36  ;;  %1479 = vst [vmem:[%s2592_s13 + $0x140] sm:$0xff] (%p1886_p6), %v1478_v14 }
 0x2aa   : > { %v1333_v19 = vpop.f32.mrb[44].mxu1  ;;  %1481 = vst [vmem:[%s2592_s13 + $0x148] sm:$0xff] (%p1886_p6), %v1480_v42 }
 0x2ab   : > { %v1334_v21 = vadd.f32 %v1333_v19, %v2452_v63  ;;  %v1335_v49 = vpop.f32.mrb[45].mxu1  ;;  %v1486_v19 = vld [vmem:[%s2420_s7 + $0xc0] sm:$0xff] (%p1886_p6) }
 0x2ac   : > { %v1336_v52 = vadd.f32 %v1335_v49, %v2452_v63  ;;  %v1337_v22 = vpop.f32.mrb[46].mxu1  ;;  %v1474_v13 = vld [vmem:[%s2420_s7 + $0x90] sm:$0xff] (%p1886_p6)  ;;  %1487 = vst [vmem:[%s2592_s13 + $0x180] sm:$0xff] (%p1886_p6), %v1486_v19 }
 0x2ad   : > { %1394 = vst [vmem:[%s2420_s7 + $0xd0] sm:$0xff] %v1334_v21  ;;  %v1338_v24 = vadd.f32 %v1337_v22, %v2455_v4  ;;  %v1339_v25 = vpop.f32.mrb[47].mxu1  ;;  %v1476_v41 = vld [vmem:[%s2420_s7 + $0x98] sm:$0xff] (%p1886_p6)  ;;  %1475 = vst [vmem:[%s2592_s13 + $0x110] sm:$0xff] (%p1886_p6), %v1474_v13  ;;  %v1488_v21 = vld [vmem:[%s2420_s7 + $0xc8] sm:$0xff] (%p1886_p6) }
 0x2ae   : > { %1395 = vst [vmem:[%s2420_s7 + $0xd8] sm:$0xff] %v1336_v52  ;;  %v1340_v18 = vadd.f32 %v1339_v25, %v2455_v4  ;;  %1477 = vst [vmem:[%s2592_s13 + $0x118] sm:$0xff] (%p1886_p6), %v1476_v41  ;;  %v1482_v17 = vld [vmem:[%s2420_s7 + $0xb0] sm:$0xff] (%p1886_p6)  ;;  %v1494_v22 = vld [vmem:[%s2420_s7 + $0xe0] sm:$0xff] (%p1886_p6) }
 0x2af   : > { %1396 = vst [vmem:[%s2420_s7 + $0xf0] sm:$0xff] %v1338_v24  ;;  %v1484_v45 = vld [vmem:[%s2420_s7 + $0xb8] sm:$0xff] (%p1886_p6)  ;;  %1483 = vst [vmem:[%s2592_s13 + $0x150] sm:$0xff] (%p1886_p6), %v1482_v17  ;;  %v1496_v24 = vld [vmem:[%s2420_s7 + $0xe8] sm:$0xff] (%p1886_p6) }
 0x2b0   : > { %1397 = vst [vmem:[%s2420_s7 + $0xf8] sm:$0xff] %v1340_v18  ;;  %1485 = vst [vmem:[%s2592_s13 + $0x158] sm:$0xff] (%p1886_p6), %v1484_v45 }
 0x2b1   : > { %1489 = vst [vmem:[%s2592_s13 + $0x188] sm:$0xff] (%p1886_p6), %v1488_v21  ;;  %1495 = vst [vmem:[%s2592_s13 + $0x1c0] sm:$0xff] (%p1886_p6), %v1494_v22 }
 0x2b2   : > { %v1343_v26 = vpop.f32.mrb[48].mxu1  ;;  %1497 = vst [vmem:[%s2592_s13 + $0x1c8] sm:$0xff] (%p1886_p6), %v1496_v24 }
 0x2b3   : > { %v1344_v27 = vadd.f32 %v1343_v26, %v2464_v11  ;;  %v1345_v28 = vpop.f32.mrb[49].mxu1  ;;  %v1502_v26 = vld [vmem:[%s2420_s7 + $0x100] sm:$0xff] (%p1886_p6) }
 0x2b4   : > { %v1346_v63 = vadd.f32 %v1345_v28, %v2464_v11  ;;  %v1347_v29 = vpop.f32.mrb[50].mxu1  ;;  %v1490_v49 = vld [vmem:[%s2420_s7 + $0xd0] sm:$0xff] (%p1886_p6)  ;;  %1503 = vst [vmem:[%s2592_s13 + $0x200] sm:$0xff] (%p1886_p6), %v1502_v26 }
 0x2b5   : > { %1398 = vst [vmem:[%s2420_s7 + $0x110] sm:$0xff] %v1344_v27  ;;  %v1348_v32 = vadd.f32 %v1347_v29, %v2467_v16  ;;  %v1349_v58 = vpop.f32.mrb[51].mxu1  ;;  %1491 = vst [vmem:[%s2592_s13 + $0x190] sm:$0xff] (%p1886_p6), %v1490_v49  ;;  %v1492_v52 = vld [vmem:[%s2420_s7 + $0xd8] sm:$0xff] (%p1886_p6)  ;;  %v1504_v27 = vld [vmem:[%s2420_s7 + $0x108] sm:$0xff] (%p1886_p6) }
 0x2b6   : > { %1399 = vst [vmem:[%s2420_s7 + $0x118] sm:$0xff] %v1346_v63  ;;  %v1350_v4 = vadd.f32 %v1349_v58, %v2467_v16  ;;  %1493 = vst [vmem:[%s2592_s13 + $0x198] sm:$0xff] (%p1886_p6), %v1492_v52  ;;  %v1498_v25 = vld [vmem:[%s2420_s7 + $0xf0] sm:$0xff] (%p1886_p6)  ;;  %v1510_v29 = vld [vmem:[%s2420_s7 + $0x120] sm:$0xff] (%p1886_p6) }
 0x2b7   : > { %1400 = vst [vmem:[%s2420_s7 + $0x130] sm:$0xff] %v1348_v32  ;;  %v1500_v18 = vld [vmem:[%s2420_s7 + $0xf8] sm:$0xff] (%p1886_p6)  ;;  %1499 = vst [vmem:[%s2592_s13 + $0x1d0] sm:$0xff] (%p1886_p6), %v1498_v25  ;;  %v1512_v32 = vld [vmem:[%s2420_s7 + $0x128] sm:$0xff] (%p1886_p6) }
 0x2b8   : > { %1401 = vst [vmem:[%s2420_s7 + $0x138] sm:$0xff] %v1350_v4  ;;  %1501 = vst [vmem:[%s2592_s13 + $0x1d8] sm:$0xff] (%p1886_p6), %v1500_v18 }
 0x2b9   : > { %1505 = vst [vmem:[%s2592_s13 + $0x208] sm:$0xff] (%p1886_p6), %v1504_v27  ;;  %1511 = vst [vmem:[%s2592_s13 + $0x240] sm:$0xff] (%p1886_p6), %v1510_v29 }
 0x2ba   : > { %v1353_v35 = vpop.f32.mrb[52].mxu1  ;;  %1513 = vst [vmem:[%s2592_s13 + $0x248] sm:$0xff] (%p1886_p6), %v1512_v32 }
 0x2bb   : > { %v1354_v37 = vadd.f32 %v1353_v35, %v2476_v23  ;;  %v1355_v5 = vpop.f32.mrb[53].mxu1  ;;  %v1518_v35 = vld [vmem:[%s2420_s7 + $0x140] sm:$0xff] (%p1886_p6) }
 0x2bc   : > { %v1356_v11 = vadd.f32 %v1355_v5, %v2476_v23  ;;  %v1357_v15 = vpop.f32.mrb[54].mxu1  ;;  %v1506_v28 = vld [vmem:[%s2420_s7 + $0x110] sm:$0xff] (%p1886_p6)  ;;  %1519 = vst [vmem:[%s2592_s13 + $0x280] sm:$0xff] (%p1886_p6), %v1518_v35 }
 0x2bd   : > { %1402 = vst [vmem:[%s2420_s7 + $0x150] sm:$0xff] %v1354_v37  ;;  %v1358_v31 = vadd.f32 %v1357_v15, %v2479_v54  ;;  %v1359_v38 = vpop.f32.mrb[55].mxu1  ;;  %v1508_v63 = vld [vmem:[%s2420_s7 + $0x118] sm:$0xff] (%p1886_p6)  ;;  %1507 = vst [vmem:[%s2592_s13 + $0x210] sm:$0xff] (%p1886_p6), %v1506_v28  ;;  %v1520_v37 = vld [vmem:[%s2420_s7 + $0x148] sm:$0xff] (%p1886_p6) }
 0x2be   : > { %1403 = vst [vmem:[%s2420_s7 + $0x158] sm:$0xff] %v1356_v11  ;;  %v1360_v16 = vadd.f32 %v1359_v38, %v2479_v54  ;;  %1509 = vst [vmem:[%s2592_s13 + $0x218] sm:$0xff] (%p1886_p6), %v1508_v63  ;;  %v1514_v58 = vld [vmem:[%s2420_s7 + $0x130] sm:$0xff] (%p1886_p6)  ;;  %v1526_v15 = vld [vmem:[%s2420_s7 + $0x160] sm:$0xff] (%p1886_p6) }
 0x2bf   : > { %1404 = vst [vmem:[%s2420_s7 + $0x170] sm:$0xff] %v1358_v31  ;;  %1515 = vst [vmem:[%s2592_s13 + $0x250] sm:$0xff] (%p1886_p6), %v1514_v58  ;;  %v1516_v4 = vld [vmem:[%s2420_s7 + $0x138] sm:$0xff] (%p1886_p6)  ;;  %v1528_v31 = vld [vmem:[%s2420_s7 + $0x168] sm:$0xff] (%p1886_p6) }
 0x2c0   : > { %1405 = vst [vmem:[%s2420_s7 + $0x178] sm:$0xff] %v1360_v16  ;;  %1517 = vst [vmem:[%s2592_s13 + $0x258] sm:$0xff] (%p1886_p6), %v1516_v4 }
 0x2c1   : > { %1521 = vst [vmem:[%s2592_s13 + $0x288] sm:$0xff] (%p1886_p6), %v1520_v37  ;;  %1527 = vst [vmem:[%s2592_s13 + $0x2c0] sm:$0xff] (%p1886_p6), %v1526_v15 }
 0x2c2   : > { %v1363_v39 = vpop.f32.mrb[56].mxu1  ;;  %1529 = vst [vmem:[%s2592_s13 + $0x2c8] sm:$0xff] (%p1886_p6), %v1528_v31 }
 0x2c3   : > { %v1364_v0 = vadd.f32 %v1363_v39, %v2488_v34  ;;  %v1365_v1 = vpop.f32.mrb[57].mxu1  ;;  %v1534_v39 = vld [vmem:[%s2420_s7 + $0x180] sm:$0xff] (%p1886_p6) }
 0x2c4   : > { %v1366_v23 = vadd.f32 %v1365_v1, %v2488_v34  ;;  %v1367_v61 = vpop.f32.mrb[58].mxu1  ;;  %v1522_v5 = vld [vmem:[%s2420_s7 + $0x150] sm:$0xff] (%p1886_p6)  ;;  %1535 = vst [vmem:[%s2592_s13 + $0x300] sm:$0xff] (%p1886_p6), %v1534_v39 }
 0x2c5   : > { %1406 = vst [vmem:[%s2420_s7 + $0x190] sm:$0xff] %v1364_v0  ;;  %v1368_v43 = vadd.f32 %v1367_v61, %v2491_v33  ;;  %v1369_v46 = vpop.f32.mrb[59].mxu1  ;;  %v1524_v11 = vld [vmem:[%s2420_s7 + $0x158] sm:$0xff] (%p1886_p6)  ;;  %1523 = vst [vmem:[%s2592_s13 + $0x290] sm:$0xff] (%p1886_p6), %v1522_v5  ;;  %v1536_v0 = vld [vmem:[%s2420_s7 + $0x188] sm:$0xff] (%p1886_p6) }
 0x2c6   : > { %1407 = vst [vmem:[%s2420_s7 + $0x198] sm:$0xff] %v1366_v23  ;;  %v1370_v54 = vadd.f32 %v1369_v46, %v2491_v33  ;;  %v1438_v33 = vld [vmem:[%s2420_s7] sm:$0xff] (%p1886_p6)  ;;  %1525 = vst [vmem:[%s2592_s13 + $0x298] sm:$0xff] (%p1886_p6), %v1524_v11  ;;  %v1530_v38 = vld [vmem:[%s2420_s7 + $0x170] sm:$0xff] (%p1886_p6) }
 0x2c7   : > { %1408 = vst [vmem:[%s2420_s7 + $0x1b0] sm:$0xff] %v1368_v43  ;;  %1439 = vst [vmem:[%s2592_s13] sm:$0xff] (%p1886_p6), %v1438_v33  ;;  %v1532_v16 = vld [vmem:[%s2420_s7 + $0x178] sm:$0xff] (%p1886_p6)  ;;  %v1542_v61 = vld [vmem:[%s2420_s7 + $0x1a0] sm:$0xff] (%p1886_p6) }
 0x2c8   : > { %1409 = vst [vmem:[%s2420_s7 + $0x1b8] sm:$0xff] %v1370_v54  ;;  %1531 = vst [vmem:[%s2592_s13 + $0x2d0] sm:$0xff] (%p1886_p6), %v1530_v38  ;;  %v1544_v43 = vld [vmem:[%s2420_s7 + $0x1a8] sm:$0xff] (%p1886_p6) }
 0x2c9   : > { %1533 = vst [vmem:[%s2592_s13 + $0x2d8] sm:$0xff] (%p1886_p6), %v1532_v16  ;;  %1537 = vst [vmem:[%s2592_s13 + $0x308] sm:$0xff] (%p1886_p6), %v1536_v0 }
 0x2ca   : > { %v1373_v48 = vpop.f32.mrb[60].mxu1  ;;  %1420 = sbr.rel (!%p1886_p6) target bundleno = 729 (0x2d9), region = 67  ;;  %1543 = vst [vmem:[%s2592_s13 + $0x340] sm:$0xff] (%p1886_p6), %v1542_v61  ;;  %1545 = vst [vmem:[%s2592_s13 + $0x348] sm:$0xff] (%p1886_p6), %v1544_v43 }
 0x2cb   : > { %v1374_v12 = vadd.f32 %v1373_v48, %v2500_v40  ;;  %v1375_v50 = vpop.f32.mrb[61].mxu1  ;;  %v1550_v48 = vld [vmem:[%s2420_s7 + $0x1c0] sm:$0xff] (%p1886_p6) }
 0x2cc   : > { %v1376_v51 = vadd.f32 %v1375_v50, %v2500_v40  ;;  %v1377_v34 = vpop.f32.mrb[62].mxu1  ;;  %v1440_v40 = vld [vmem:[%s2420_s7 + $0x8] sm:$0xff] (%p1886_p6)  ;;  %v1538_v1 = vld [vmem:[%s2420_s7 + $0x190] sm:$0xff] (%p1886_p6)  ;;  %1551 = vst [vmem:[%s2592_s13 + $0x380] sm:$0xff] (%p1886_p6), %v1550_v48 }
 0x2cd   : > { %1410 = vst [vmem:[%s2420_s7 + $0x1d0] sm:$0xff] %v1374_v12  ;;  %v1378_v53 = vadd.f32 %v1377_v34, %v2503_v44  ;;  %v1379_v55 = vpop.f32.mrb[63].mxu1  ;;  %1441 = vst [vmem:[%s2592_s13 + $0x8] sm:$0xff] (%p1886_p6), %v1440_v40  ;;  %v1540_v23 = vld [vmem:[%s2420_s7 + $0x198] sm:$0xff] (%p1886_p6)  ;;  %v1552_v12 = vld [vmem:[%s2420_s7 + $0x1c8] sm:$0xff] (%p1886_p6) }
 0x2ce   : > { %1411 = vst [vmem:[%s2420_s7 + $0x1d8] sm:$0xff] %v1376_v51  ;;  %v1380_v56 = vadd.f32 %v1379_v55, %v2503_v44  ;;  %v1442_v44 = vld [vmem:[%s2420_s7 + $0x10] sm:$0xff] (%p1886_p6)  ;;  %1539 = vst [vmem:[%s2592_s13 + $0x310] sm:$0xff] (%p1886_p6), %v1538_v1  ;;  %v1558_v34 = vld [vmem:[%s2420_s7 + $0x1e0] sm:$0xff] (%p1886_p6) }
 0x2cf   : > { %1412 = vst [vmem:[%s2420_s7 + $0x1f0] sm:$0xff] %v1378_v53  ;;  %1443 = vst [vmem:[%s2592_s13 + $0x10] sm:$0xff] (%p1886_p6), %v1442_v44  ;;  %v1546_v46 = vld [vmem:[%s2420_s7 + $0x1b0] sm:$0xff] (%p1886_p6)  ;;  %v1548_v54 = vld [vmem:[%s2420_s7 + $0x1b8] sm:$0xff] (%p1886_p6) }
 0x2d0   : > { %1413 = vst [vmem:[%s2420_s7 + $0x1f8] sm:$0xff] %v1380_v56  ;;  %1541 = vst [vmem:[%s2592_s13 + $0x318] sm:$0xff] (%p1886_p6), %v1540_v23  ;;  %v1560_v53 = vld [vmem:[%s2420_s7 + $0x1e8] sm:$0xff] (%p1886_p6) }
 0x2d1   : > { %1547 = vst [vmem:[%s2592_s13 + $0x350] sm:$0xff] %v1546_v46  ;;  %1549 = vst [vmem:[%s2592_s13 + $0x358] sm:$0xff] %v1548_v54 }
 0x2d2   : > { %1553 = vst [vmem:[%s2592_s13 + $0x388] sm:$0xff] %v1552_v12  ;;  %1559 = vst [vmem:[%s2592_s13 + $0x3c0] sm:$0xff] %v1558_v34 }
 0x2d3   : > { %1561 = vst [vmem:[%s2592_s13 + $0x3c8] sm:$0xff] %v1560_v53 }
 0x2d4   : > { %v1554_v50 = vld [vmem:[%s2420_s7 + $0x1d0] sm:$0xff] }
 0x2d5   : > { %v1556_v51 = vld [vmem:[%s2420_s7 + $0x1d8] sm:$0xff]  ;;  %1555 = vst [vmem:[%s2592_s13 + $0x390] sm:$0xff] %v1554_v50 }
 0x2d6   : > { %1557 = vst [vmem:[%s2592_s13 + $0x398] sm:$0xff] %v1556_v51  ;;  %v1562_v55 = vld [vmem:[%s2420_s7 + $0x1f0] sm:$0xff] }
 0x2d7   : > { %1563 = vst [vmem:[%s2592_s13 + $0x3d0] sm:$0xff] %v1562_v55  ;;  %v1564_v56 = vld [vmem:[%s2420_s7 + $0x1f8] sm:$0xff] }
 0x2d8   : > { %1565 = vst [vmem:[%s2592_s13 + $0x3d8] sm:$0xff] %v1564_v56 }
 0x2d9 PF: > { %s15_s24 = sadd.s32 1, %s1805_s24   ;;  %s2741_s18 = smov %s1785_s19 }
 0x2da   : > { %p12_p12 = scmp.ge.s32.totalorder %s15_s24, 6   ;;  %s2742_s19 = smov %s1894_s8 }
 0x2db   : > { %s2743_s20 = smov %s1797_s22  ;;  %s2744_s21 = smov %s1801_s23 }
 0x2dc   : > { %s2745_s22 = smov %s2748_s25  ;;  %s2746_s23 = smov %s2752_s26 }
 0x2dd   :  { %14 = sbr.rel (!%p12_p12) target bundleno = 4 (0x4), region = 121 }

</bundles_post_ra>
